<compile_context>
chip_gen: v6e
topology: v6e:2x2x1
jax: 0.10.0
libtpu: 0.0.40
codegen_flags: <defaults>
</compile_context>

<pallas_src>
import functools

import jax
import jax.numpy as jnp
import numpy as np
from jax.experimental import pallas as pl
from jax.experimental.pallas import tpu as pltpu

EPS = 1e-5


def basic_block_kernel(col_ref, vext_ref, vmask_ref, xc_ref,
                       w1_ref, g1_ref, b1_ref,
                       w2_ref, g2_ref, b2_ref,
                       ws_ref, gs_ref, bs_ref,
                       o_ref, col2_ref, *, Wp, margin, inv_M):
    Cout, Mp = o_ref.shape

    def bn_affine(x, g_ref, b_ref, valid=None):
        # Training-mode BatchNorm over the M valid pixels, one-pass stats
        # (E[x^2]-mean^2, biased), applied as a per-channel scale/shift.
        xv = x if valid is None else x * valid
        mean = jnp.sum(xv, axis=1, keepdims=True) * inv_M
        ex2 = jnp.sum(xv * x, axis=1, keepdims=True) * inv_M
        var = ex2 - mean * mean
        scale = g_ref[...] * jax.lax.rsqrt(var + EPS)
        shift = b_ref[...] - mean * scale
        return x * scale + shift

    v_ext = vext_ref[...]                       # (1, Lext) valid-pixel mask
    v_mp = vmask_ref[...]                       # (1, Mp)   valid-pixel mask

    # ---- conv1: one MXU matmul over the wrapper-built im2col ----------------
    acc1 = jnp.dot(w1_ref[...], col_ref[...], preferred_element_type=jnp.float32)
    # masked BN + ReLU; masking zeroes border/margin columns -> conv2's padding.
    out1 = jnp.maximum(bn_affine(acc1, g1_ref, b1_ref, valid=v_ext), 0.0) * v_ext

    # ---- conv2: stack 9 lane-shifted windows into scratch, one K=72 matmul ---
    for kh in range(3):
        for kw in range(3):
            t = kh * 3 + kw
            s = margin + (kh - 1) * Wp + (kw - 1)
            col2_ref[pl.ds(t * Cout, Cout), :] = out1[:, s:s + Mp]
    acc2 = jnp.dot(w2_ref[...], col2_ref[...], preferred_element_type=jnp.float32)
    out2 = bn_affine(acc2, g2_ref, b2_ref, valid=v_mp)

    # ---- shortcut: 1x1 conv + BN on the center-tap slab (zero at invalid
    # columns, so its stats need no mask multiply) -----------------------------
    sc_acc = jnp.dot(ws_ref[...], xc_ref[...], preferred_element_type=jnp.float32)
    sc = bn_affine(sc_acc, gs_ref, bs_ref, valid=None)

    # residual add + final ReLU; (Cout, Mp) store is a full lane-dense slab.
    # NOTE: columns at padded/border pixels hold garbage; the wrapper crops them.
    o_ref[...] = jnp.maximum(out2 + sc, 0.0)


@jax.jit
def basic_block_forward(x_nchw, params):
    x = x_nchw.astype(jnp.float32)
    N, Cin, H, W = x.shape
    Cout = params["w1"].shape[-1]
    Hp, Wp = H + 2, W + 2
    M = N * H * W                                # valid pixels for BN stats
    Mp_raw = N * Hp * Wp                         # flattened padded grid
    Mp = ((Mp_raw + 127) // 128) * 128           # lane-dense pixel axis (648->768)
    margin = ((Wp + 1 + 63) // 64) * 64          # >= Wp+1, keeps Lext 128-aligned
    Lext = Mp + 2 * margin

    # im2col of x over the *padded* output grid, built in XLA so it fuses with
    # the pad/transpose.  Row order = (tap=kh*3+kw, c); column = flat (n,h',w').
    xp2 = jnp.pad(x, ((0, 0), (0, 0), (2, 2), (2, 2)))          # (N,Cin,H+4,W+4)
    taps = [xp2[:, :, kh:kh + Hp, kw:kw + Wp]
            for kh in range(3) for kw in range(3)]
    col = jnp.stack(taps, axis=0).transpose(0, 2, 1, 3, 4)      # (9,Cin,N,Hp,Wp)
    col = col.reshape(9 * Cin, Mp_raw)
    col_ext = jnp.pad(col, ((0, 0), (margin, Lext - margin - Mp_raw)))

    # center-tap slab (x padded by 1) feeds the 1x1 shortcut conv directly.
    x_center = jnp.pad(col[4 * Cin:5 * Cin, :], ((0, 0), (0, Mp - Mp_raw)))

    # valid-pixel mask over the padded grid.
    vh = (jnp.arange(Hp) >= 1) & (jnp.arange(Hp) <= H)
    vw = (jnp.arange(Wp) >= 1) & (jnp.arange(Wp) <= W)
    v = (vh[:, None] & vw[None, :]).astype(jnp.float32)         # (Hp, Wp)
    vmask_raw = jnp.tile(v[None], (N, 1, 1)).reshape(1, Mp_raw)
    vmask = jnp.pad(vmask_raw, ((0, 0), (0, Mp - Mp_raw)))
    vmask_ext = jnp.pad(vmask_raw, ((0, 0), (margin, Lext - margin - Mp_raw)))

    # weight / BN-parameter re-layouts (channels on sublanes).
    w1r = params["w1"].transpose(3, 0, 1, 2).reshape(Cout, 9 * Cin)
    w2r = params["w2"].transpose(3, 0, 1, 2).reshape(Cout, 9 * Cout)
    wsr = params["ws"].T                                        # (Cout, Cin)

    def cvec(p):                                                # (1,C) -> (C,1)
        return p.reshape(-1, 1)

    vmem = pl.BlockSpec(memory_space=pltpu.MemorySpace.VMEM)
    kernel = functools.partial(basic_block_kernel,
                               Wp=Wp, margin=margin, inv_M=1.0 / M)
    out_flat = pl.pallas_call(
        kernel,
        out_shape=jax.ShapeDtypeStruct((Cout, Mp), jnp.float32),
        in_specs=[vmem] * 13,
        out_specs=vmem,
        scratch_shapes=[pltpu.VMEM((9 * Cout, Mp), jnp.float32)],
    )(col_ext, vmask_ext, vmask, x_center,
      w1r, cvec(params["g1"]), cvec(params["b1"]),
      w2r, cvec(params["g2"]), cvec(params["b2"]),
      wsr, cvec(params["gs"]), cvec(params["bs"]))

    # (Cout, Mp) -> NCHW, dropping the lane padding and the border columns.
    out = out_flat[:, :Mp_raw].reshape(Cout, N, Hp, Wp)[:, :, 1:H + 1, 1:W + 1]
    return out.transpose(1, 0, 2, 3)


def reference_forward(x_nchw, params):
    # Pure-JAX reference (independent of the kernel) for a correctness check.
    x = jnp.transpose(x_nchw, (0, 2, 3, 1)).astype(jnp.float32)

    def conv(z, w, pad):
        return jax.lax.conv_general_dilated(
            z, w, window_strides=(1, 1), padding=[(pad, pad), (pad, pad)],
            dimension_numbers=("NHWC", "HWIO", "NHWC"))

    def bn(z, g, b):
        mean = jnp.mean(z, axis=(0, 1, 2), keepdims=True)
        var = jnp.mean((z - mean) ** 2, axis=(0, 1, 2), keepdims=True)
        return ((z - mean) * jax.lax.rsqrt(var + EPS)
                * g.reshape(1, 1, 1, -1) + b.reshape(1, 1, 1, -1))

    out = jax.nn.relu(bn(conv(x, params["w1"], 1), params["g1"], params["b1"]))
    out = bn(conv(out, params["w2"], 1), params["g2"], params["b2"])
    ws4 = params["ws"].reshape(1, 1, *params["ws"].shape)
    sc = bn(conv(x, ws4, 0), params["gs"], params["bs"])
    out = jax.nn.relu(out + sc)
    return jnp.transpose(out, (0, 3, 1, 2))


def init_params(key, in_planes, planes):
    ks = jax.random.split(key, 9)

    def he(k, shape, fan_in):
        return jax.random.normal(k, shape, jnp.float32) * (2.0 / fan_in) ** 0.5

    return dict(
        w1=he(ks[0], (3, 3, in_planes, planes), 9 * in_planes),
        w2=he(ks[1], (3, 3, planes, planes), 9 * planes),
        ws=he(ks[2], (in_planes, planes), in_planes),
        g1=1.0 + 0.1 * jax.random.normal(ks[3], (1, planes), jnp.float32),
        b1=0.1 * jax.random.normal(ks[4], (1, planes), jnp.float32),
        g2=1.0 + 0.1 * jax.random.normal(ks[5], (1, planes), jnp.float32),
        b2=0.1 * jax.random.normal(ks[6], (1, planes), jnp.float32),
        gs=1.0 + 0.1 * jax.random.normal(ks[7], (1, planes), jnp.float32),
        bs=0.1 * jax.random.normal(ks[8], (1, planes), jnp.float32),
    )


if __name__ == "__main__":
    key = jax.random.PRNGKey(0)
    kx, kp = jax.random.split(key)

    in_planes, planes = 4, 8
    N, H, W = 2, 16, 16

    x = jax.random.normal(kx, (N, in_planes, H, W), jnp.float32)   # NCHW input
    params = init_params(kp, in_planes, planes)

    out = jax.block_until_ready(basic_block_forward(x, params))
    ref = jax.block_until_ready(reference_forward(x, params))

    assert out.shape == (N, planes, H, W)
    np.testing.assert_allclose(np.asarray(out), np.asarray(ref),
                               atol=1e-3, rtol=1e-3)
    print("KERNEL_OK")
</pallas_src>

<mosaic_0001>
module attributes {stable_mosaic.version = 11 : i64} {
  func.func @basic_block_kernel(%arg0: memref<36x896xf32, #tpu.memory_space<vmem>>, %arg1: memref<1x896xf32, #tpu.memory_space<vmem>>, %arg2: memref<1x768xf32, #tpu.memory_space<vmem>>, %arg3: memref<4x768xf32, #tpu.memory_space<vmem>>, %arg4: memref<8x36xf32, #tpu.memory_space<vmem>>, %arg5: memref<8x1xf32, #tpu.memory_space<vmem>>, %arg6: memref<8x1xf32, #tpu.memory_space<vmem>>, %arg7: memref<8x72xf32, #tpu.memory_space<vmem>>, %arg8: memref<8x1xf32, #tpu.memory_space<vmem>>, %arg9: memref<8x1xf32, #tpu.memory_space<vmem>>, %arg10: memref<8x4xf32, #tpu.memory_space<vmem>>, %arg11: memref<8x1xf32, #tpu.memory_space<vmem>>, %arg12: memref<8x1xf32, #tpu.memory_space<vmem>>, %arg13: memref<8x768xf32, #tpu.memory_space<vmem>>, %arg14: memref<72x768xf32, #tpu.memory_space<vmem>>) attributes {dimension_semantics = [], scalar_prefetch = 0 : i64, scratch_operands = 1 : i64, tpu.core_type = #tpu.core_type<tc>} {
    %c0 = arith.constant 0 : index
    %c0_0 = arith.constant 0 : index
    %0 = vector.load %arg1[%c0, %c0_0] : memref<1x896xf32, #tpu.memory_space<vmem>>, vector<1x896xf32>
    %c0_1 = arith.constant 0 : index
    %c0_2 = arith.constant 0 : index
    %1 = vector.load %arg2[%c0_1, %c0_2] : memref<1x768xf32, #tpu.memory_space<vmem>>, vector<1x768xf32>
    %c0_3 = arith.constant 0 : index
    %c0_4 = arith.constant 0 : index
    %2 = vector.load %arg4[%c0_3, %c0_4] : memref<8x36xf32, #tpu.memory_space<vmem>>, vector<8x36xf32>
    %c0_5 = arith.constant 0 : index
    %c0_6 = arith.constant 0 : index
    %3 = vector.load %arg0[%c0_5, %c0_6] : memref<36x896xf32, #tpu.memory_space<vmem>>, vector<36x896xf32>
    %cst = arith.constant dense<0.000000e+00> : vector<8x896xf32>
    %4 = tpu.matmul %2, %3, %cst {dimension_numbers = #tpu.dot_dimension_numbers<[1], [0], [0], [1], [0, 0, 1, 1], [], []>} : vector<8x36xf32>, vector<36x896xf32>, vector<8x896xf32> -> vector<8x896xf32>
    %5 = vector.broadcast %0 : vector<1x896xf32> to vector<8x896xf32>
    %6 = arith.mulf %4, %5 : vector<8x896xf32>
    %cst_7 = arith.constant dense<0.000000e+00> : vector<8xf32>
    %7 = vector.multi_reduction <add>, %6, %cst_7 [1] : vector<8x896xf32> to vector<8xf32>
    %8 = vector.shape_cast %7 : vector<8xf32> to vector<8x1xf32>
    %cst_8 = arith.constant 0.001953125 : f32
    %9 = vector.broadcast %cst_8 : f32 to vector<8x1xf32>
    %10 = arith.mulf %8, %9 : vector<8x1xf32>
    %11 = arith.mulf %6, %4 : vector<8x896xf32>
    %cst_9 = arith.constant dense<0.000000e+00> : vector<8xf32>
    %12 = vector.multi_reduction <add>, %11, %cst_9 [1] : vector<8x896xf32> to vector<8xf32>
    %13 = vector.shape_cast %12 : vector<8xf32> to vector<8x1xf32>
    %cst_10 = arith.constant 0.001953125 : f32
    %14 = vector.broadcast %cst_10 : f32 to vector<8x1xf32>
    %15 = arith.mulf %13, %14 : vector<8x1xf32>
    %16 = arith.mulf %10, %10 : vector<8x1xf32>
    %17 = arith.subf %15, %16 : vector<8x1xf32>
    %c0_11 = arith.constant 0 : index
    %c0_12 = arith.constant 0 : index
    %18 = vector.load %arg5[%c0_11, %c0_12] : memref<8x1xf32, #tpu.memory_space<vmem>>, vector<8x1xf32>
    %cst_13 = arith.constant 9.99999974E-6 : f32
    %19 = vector.broadcast %cst_13 : f32 to vector<8x1xf32>
    %20 = arith.addf %17, %19 : vector<8x1xf32>
    %21 = math.rsqrt %20 : vector<8x1xf32>
    %22 = arith.mulf %18, %21 : vector<8x1xf32>
    %c0_14 = arith.constant 0 : index
    %c0_15 = arith.constant 0 : index
    %23 = vector.load %arg6[%c0_14, %c0_15] : memref<8x1xf32, #tpu.memory_space<vmem>>, vector<8x1xf32>
    %24 = arith.mulf %10, %22 : vector<8x1xf32>
    %25 = arith.subf %23, %24 : vector<8x1xf32>
    %26 = vector.broadcast %22 : vector<8x1xf32> to vector<8x896xf32>
    %27 = arith.mulf %4, %26 : vector<8x896xf32>
    %28 = vector.broadcast %25 : vector<8x1xf32> to vector<8x896xf32>
    %29 = arith.addf %27, %28 : vector<8x896xf32>
    %cst_16 = arith.constant 0.000000e+00 : f32
    %30 = vector.broadcast %cst_16 : f32 to vector<8x896xf32>
    %31 = arith.maximumf %29, %30 : vector<8x896xf32>
    %32 = vector.broadcast %0 : vector<1x896xf32> to vector<8x896xf32>
    %33 = arith.mulf %31, %32 : vector<8x896xf32>
    %34 = vector.extract_strided_slice %33 {offsets = [0, 45], sizes = [8, 768], strides = [1, 1]} : vector<8x896xf32> to vector<8x768xf32>
    %c0_17 = arith.constant 0 : index
    %c0_18 = arith.constant 0 : index
    %35 = vector.load %arg14[%c0_17, %c0_18] : memref<72x768xf32, #tpu.memory_space<vmem>>, vector<8x768xf32>
    tpu.vector_store %arg14[%c0_17, %c0_18], %34 {strides = array<i32>} : memref<72x768xf32, #tpu.memory_space<vmem>>, vector<8x768xf32>,
    %36 = vector.extract_strided_slice %33 {offsets = [0, 46], sizes = [8, 768], strides = [1, 1]} : vector<8x896xf32> to vector<8x768xf32>
    %c8 = arith.constant 8 : index
    %c0_19 = arith.constant 0 : index
    %37 = vector.load %arg14[%c8, %c0_19] : memref<72x768xf32, #tpu.memory_space<vmem>>, vector<8x768xf32>
    tpu.vector_store %arg14[%c8, %c0_19], %36 {strides = array<i32>} : memref<72x768xf32, #tpu.memory_space<vmem>>, vector<8x768xf32>,
    %38 = vector.extract_strided_slice %33 {offsets = [0, 47], sizes = [8, 768], strides = [1, 1]} : vector<8x896xf32> to vector<8x768xf32>
    %c16 = arith.constant 16 : index
    %c0_20 = arith.constant 0 : index
    %39 = vector.load %arg14[%c16, %c0_20] : memref<72x768xf32, #tpu.memory_space<vmem>>, vector<8x768xf32>
    tpu.vector_store %arg14[%c16, %c0_20], %38 {strides = array<i32>} : memref<72x768xf32, #tpu.memory_space<vmem>>, vector<8x768xf32>,
    %40 = vector.extract_strided_slice %33 {offsets = [0, 63], sizes = [8, 768], strides = [1, 1]} : vector<8x896xf32> to vector<8x768xf32>
    %c24 = arith.constant 24 : index
    %c0_21 = arith.constant 0 : index
    %41 = vector.load %arg14[%c24, %c0_21] : memref<72x768xf32, #tpu.memory_space<vmem>>, vector<8x768xf32>
    tpu.vector_store %arg14[%c24, %c0_21], %40 {strides = array<i32>} : memref<72x768xf32, #tpu.memory_space<vmem>>, vector<8x768xf32>,
    %42 = vector.extract_strided_slice %33 {offsets = [0, 64], sizes = [8, 768], strides = [1, 1]} : vector<8x896xf32> to vector<8x768xf32>
    %c32 = arith.constant 32 : index
    %c0_22 = arith.constant 0 : index
    %43 = vector.load %arg14[%c32, %c0_22] : memref<72x768xf32, #tpu.memory_space<vmem>>, vector<8x768xf32>
    tpu.vector_store %arg14[%c32, %c0_22], %42 {strides = array<i32>} : memref<72x768xf32, #tpu.memory_space<vmem>>, vector<8x768xf32>,
    %44 = vector.extract_strided_slice %33 {offsets = [0, 65], sizes = [8, 768], strides = [1, 1]} : vector<8x896xf32> to vector<8x768xf32>
    %c40 = arith.constant 40 : index
    %c0_23 = arith.constant 0 : index
    %45 = vector.load %arg14[%c40, %c0_23] : memref<72x768xf32, #tpu.memory_space<vmem>>, vector<8x768xf32>
    tpu.vector_store %arg14[%c40, %c0_23], %44 {strides = array<i32>} : memref<72x768xf32, #tpu.memory_space<vmem>>, vector<8x768xf32>,
    %46 = vector.extract_strided_slice %33 {offsets = [0, 81], sizes = [8, 768], strides = [1, 1]} : vector<8x896xf32> to vector<8x768xf32>
    %c48 = arith.constant 48 : index
    %c0_24 = arith.constant 0 : index
    %47 = vector.load %arg14[%c48, %c0_24] : memref<72x768xf32, #tpu.memory_space<vmem>>, vector<8x768xf32>
    tpu.vector_store %arg14[%c48, %c0_24], %46 {strides = array<i32>} : memref<72x768xf32, #tpu.memory_space<vmem>>, vector<8x768xf32>,
    %48 = vector.extract_strided_slice %33 {offsets = [0, 82], sizes = [8, 768], strides = [1, 1]} : vector<8x896xf32> to vector<8x768xf32>
    %c56 = arith.constant 56 : index
    %c0_25 = arith.constant 0 : index
    %49 = vector.load %arg14[%c56, %c0_25] : memref<72x768xf32, #tpu.memory_space<vmem>>, vector<8x768xf32>
    tpu.vector_store %arg14[%c56, %c0_25], %48 {strides = array<i32>} : memref<72x768xf32, #tpu.memory_space<vmem>>, vector<8x768xf32>,
    %50 = vector.extract_strided_slice %33 {offsets = [0, 83], sizes = [8, 768], strides = [1, 1]} : vector<8x896xf32> to vector<8x768xf32>
    %c64 = arith.constant 64 : index
    %c0_26 = arith.constant 0 : index
    %51 = vector.load %arg14[%c64, %c0_26] : memref<72x768xf32, #tpu.memory_space<vmem>>, vector<8x768xf32>
    tpu.vector_store %arg14[%c64, %c0_26], %50 {strides = array<i32>} : memref<72x768xf32, #tpu.memory_space<vmem>>, vector<8x768xf32>,
    %c0_27 = arith.constant 0 : index
    %c0_28 = arith.constant 0 : index
    %52 = vector.load %arg7[%c0_27, %c0_28] : memref<8x72xf32, #tpu.memory_space<vmem>>, vector<8x72xf32>
    %c0_29 = arith.constant 0 : index
    %c0_30 = arith.constant 0 : index
    %53 = vector.load %arg14[%c0_29, %c0_30] : memref<72x768xf32, #tpu.memory_space<vmem>>, vector<72x768xf32>
    %cst_31 = arith.constant dense<0.000000e+00> : vector<8x768xf32>
    %54 = tpu.matmul %52, %53, %cst_31 {dimension_numbers = #tpu.dot_dimension_numbers<[1], [0], [0], [1], [0, 0, 1, 1], [], []>} : vector<8x72xf32>, vector<72x768xf32>, vector<8x768xf32> -> vector<8x768xf32>
    %55 = vector.broadcast %1 : vector<1x768xf32> to vector<8x768xf32>
    %56 = arith.mulf %54, %55 : vector<8x768xf32>
    %cst_32 = arith.constant dense<0.000000e+00> : vector<8xf32>
    %57 = vector.multi_reduction <add>, %56, %cst_32 [1] : vector<8x768xf32> to vector<8xf32>
    %58 = vector.shape_cast %57 : vector<8xf32> to vector<8x1xf32>
    %cst_33 = arith.constant 0.001953125 : f32
    %59 = vector.broadcast %cst_33 : f32 to vector<8x1xf32>
    %60 = arith.mulf %58, %59 : vector<8x1xf32>
    %61 = arith.mulf %56, %54 : vector<8x768xf32>
    %cst_34 = arith.constant dense<0.000000e+00> : vector<8xf32>
    %62 = vector.multi_reduction <add>, %61, %cst_34 [1] : vector<8x768xf32> to vector<8xf32>
    %63 = vector.shape_cast %62 : vector<8xf32> to vector<8x1xf32>
    %cst_35 = arith.constant 0.001953125 : f32
    %64 = vector.broadcast %cst_35 : f32 to vector<8x1xf32>
    %65 = arith.mulf %63, %64 : vector<8x1xf32>
    %66 = arith.mulf %60, %60 : vector<8x1xf32>
    %67 = arith.subf %65, %66 : vector<8x1xf32>
    %c0_36 = arith.constant 0 : index
    %c0_37 = arith.constant 0 : index
    %68 = vector.load %arg8[%c0_36, %c0_37] : memref<8x1xf32, #tpu.memory_space<vmem>>, vector<8x1xf32>
    %cst_38 = arith.constant 9.99999974E-6 : f32
    %69 = vector.broadcast %cst_38 : f32 to vector<8x1xf32>
    %70 = arith.addf %67, %69 : vector<8x1xf32>
    %71 = math.rsqrt %70 : vector<8x1xf32>
    %72 = arith.mulf %68, %71 : vector<8x1xf32>
    %c0_39 = arith.constant 0 : index
    %c0_40 = arith.constant 0 : index
    %73 = vector.load %arg9[%c0_39, %c0_40] : memref<8x1xf32, #tpu.memory_space<vmem>>, vector<8x1xf32>
    %74 = arith.mulf %60, %72 : vector<8x1xf32>
    %75 = arith.subf %73, %74 : vector<8x1xf32>
    %76 = vector.broadcast %72 : vector<8x1xf32> to vector<8x768xf32>
    %77 = arith.mulf %54, %76 : vector<8x768xf32>
    %78 = vector.broadcast %75 : vector<8x1xf32> to vector<8x768xf32>
    %79 = arith.addf %77, %78 : vector<8x768xf32>
    %c0_41 = arith.constant 0 : index
    %c0_42 = arith.constant 0 : index
    %80 = vector.load %arg10[%c0_41, %c0_42] : memref<8x4xf32, #tpu.memory_space<vmem>>, vector<8x4xf32>
    %c0_43 = arith.constant 0 : index
    %c0_44 = arith.constant 0 : index
    %81 = vector.load %arg3[%c0_43, %c0_44] : memref<4x768xf32, #tpu.memory_space<vmem>>, vector<4x768xf32>
    %cst_45 = arith.constant dense<0.000000e+00> : vector<8x768xf32>
    %82 = tpu.matmul %80, %81, %cst_45 {dimension_numbers = #tpu.dot_dimension_numbers<[1], [0], [0], [1], [0, 0, 1, 1], [], []>} : vector<8x4xf32>, vector<4x768xf32>, vector<8x768xf32> -> vector<8x768xf32>
    %cst_46 = arith.constant dense<0.000000e+00> : vector<8xf32>
    %83 = vector.multi_reduction <add>, %82, %cst_46 [1] : vector<8x768xf32> to vector<8xf32>
    %84 = vector.shape_cast %83 : vector<8xf32> to vector<8x1xf32>
    %cst_47 = arith.constant 0.001953125 : f32
    %85 = vector.broadcast %cst_47 : f32 to vector<8x1xf32>
    %86 = arith.mulf %84, %85 : vector<8x1xf32>
    %87 = arith.mulf %82, %82 : vector<8x768xf32>
    %cst_48 = arith.constant dense<0.000000e+00> : vector<8xf32>
    %88 = vector.multi_reduction <add>, %87, %cst_48 [1] : vector<8x768xf32> to vector<8xf32>
    %89 = vector.shape_cast %88 : vector<8xf32> to vector<8x1xf32>
    %cst_49 = arith.constant 0.001953125 : f32
    %90 = vector.broadcast %cst_49 : f32 to vector<8x1xf32>
    %91 = arith.mulf %89, %90 : vector<8x1xf32>
    %92 = arith.mulf %86, %86 : vector<8x1xf32>
    %93 = arith.subf %91, %92 : vector<8x1xf32>
    %c0_50 = arith.constant 0 : index
    %c0_51 = arith.constant 0 : index
    %94 = vector.load %arg11[%c0_50, %c0_51] : memref<8x1xf32, #tpu.memory_space<vmem>>, vector<8x1xf32>
    %cst_52 = arith.constant 9.99999974E-6 : f32
    %95 = vector.broadcast %cst_52 : f32 to vector<8x1xf32>
    %96 = arith.addf %93, %95 : vector<8x1xf32>
    %97 = math.rsqrt %96 : vector<8x1xf32>
    %98 = arith.mulf %94, %97 : vector<8x1xf32>
    %c0_53 = arith.constant 0 : index
    %c0_54 = arith.constant 0 : index
    %99 = vector.load %arg12[%c0_53, %c0_54] : memref<8x1xf32, #tpu.memory_space<vmem>>, vector<8x1xf32>
    %100 = arith.mulf %86, %98 : vector<8x1xf32>
    %101 = arith.subf %99, %100 : vector<8x1xf32>
    %102 = vector.broadcast %98 : vector<8x1xf32> to vector<8x768xf32>
    %103 = arith.mulf %82, %102 : vector<8x768xf32>
    %104 = vector.broadcast %101 : vector<8x1xf32> to vector<8x768xf32>
    %105 = arith.addf %103, %104 : vector<8x768xf32>
    %106 = arith.addf %79, %105 : vector<8x768xf32>
    %cst_55 = arith.constant 0.000000e+00 : f32
    %107 = vector.broadcast %cst_55 : f32 to vector<8x768xf32>
    %108 = arith.maximumf %106, %107 : vector<8x768xf32>
    %c0_56 = arith.constant 0 : index
    %c0_57 = arith.constant 0 : index
    %109 = vector.load %arg13[%c0_56, %c0_57] : memref<8x768xf32, #tpu.memory_space<vmem>>, vector<8x768xf32>
    tpu.vector_store %arg13[%c0_56, %c0_57], %108 {strides = array<i32>} : memref<8x768xf32, #tpu.memory_space<vmem>>, vector<8x768xf32>,
    return
  }
}

</mosaic_0001>

<bundles_post_ra>
// kernel: tile.6
= control target key start
LH: loop header
LB: loop body
LE: loop exit
PB: predicated region body
PF: predicated region fallthrough
CT: control target
= control target key end

     0   :  { %s64_s0 = inlined_call_operand.vmem [shape: f32[18,18], index: 0, kind: input, shape index: {}]   ;;  %s65_s1 = inlined_call_operand.vmem [shape: f32[2,1,1,18,1,18], index: 1, kind: output, shape index: {}]  }
   0x1   :  { %v4_v0 = vld [vmem:[%s64_s0] sm:$0xff]  ;;  %v21_v1 = vld [vmem:[%s64_s0 + $0x8] sm:$0xff]  ;;  %v24_v2 = vld [vmem:[%s64_s0 + $0x10] sm:$0xff] }
   0x2   :  { %5 = vst [vmem:[%s65_s1] sm:$0xff] %v4_v0  ;;  %20 = vst [vmem:[%s65_s1 + $0x18] sm:$0xff] %v4_v0 }
   0x3   :  { %22 = vst [vmem:[%s65_s1 + $0x8] sm:$0xff] %v21_v1  ;;  %23 = vst [vmem:[%s65_s1 + $0x20] sm:$0xff] %v21_v1 }
   0x4   :  { %25 = vst [vmem:[%s65_s1 + $0x10] sm:$0xff] %v24_v2  ;;  %26 = vst [vmem:[%s65_s1 + $0x28] sm:$0xff] %v24_v2 }

// kernel: tile.7
= control target key start
LH: loop header
LB: loop body
LE: loop exit
PB: predicated region body
PF: predicated region fallthrough
CT: control target
= control target key end

     0   :  { %vm9_vm0 = vcmask 15360   ;;  %vm36_vm1 = vcmask 48128   ;;  %s404_s14 = smov 126   ;;  %vm22_vm2 = vcmask 31744   ;;  %s405_s19 = smov 122   ;;  %vm50_vm3 = vcmask 64512   ;;  %s594_s0 = inlined_call_operand.vmem [shape: f32[2,1,1,18,1,18], index: 0, kind: input, shape index: {}]   ;;  %s595_s1 = inlined_call_operand.vmem [shape: f32[1,648], index: 1, kind: output, shape index: {}]  }
   0x1   :  { %v324_v0 = vld [vmem:[%s594_s0 + $0x7] sm:$0x1]   ;;  %v328_v3 = vld [vmem:[%s594_s0 + $0x1b] sm:$0x1]   ;;  %v326_v6 = vld [vmem:[%s594_s0 + $0xe] sm:$0x1]  }
   0x2   :  { %v325_v1 = vld [vmem:[%s594_s0 + $0x7] sm:$0x1]   ;;  %v329_v4 = vld [vmem:[%s594_s0 + $0x1b] sm:$0x1]   ;;  %v327_v7 = vld [vmem:[%s594_s0 + $0xe] sm:$0x1]  }
   0x3   :  { %v10_v2 = vsel %vm9_vm0, %v325_v1, %v324_v0  ;;  %v37_v5 = vsel %vm36_vm1, %v329_v4, %v328_v3  ;;  %v23_v8 = vsel %vm22_vm2, %v327_v7, %v326_v6  ;;  %v330_v9 = vld [vmem:[%s594_s0 + $0x22] sm:$0x1]   ;;  %vm54_vm4 = vcmask 80896   ;;  %v332_v12 = vld [vmem:[%s594_s0 + $0x29] sm:$0x1]   ;;  %s406_s28 = smov 124  }
   0x4   :  { %11 = vrot.lane.b32.xlu0 %v10_v2, %s404_s14  ;;  %38 = vrot.lane.b32.xlu1 %v37_v5, %s405_s19  ;;  %v331_v10 = vld [vmem:[%s594_s0 + $0x22] sm:$0x1]   ;;  %v333_v13 = vld [vmem:[%s594_s0 + $0x29] sm:$0x1]   ;;  %s407_s29 = smov 120   ;;  %s408_s3 = smov 118  }
   0x5   :  { %v51_v11 = vsel %vm50_vm3, %v331_v10, %v330_v9  ;;  %v65_v14 = vsel %vm54_vm4, %v333_v13, %v332_v12  ;;  %v334_v15 = vld [vmem:[%s594_s0 + $0x6] sm:$0x1]   ;;  %s409_s4 = smov 108   ;;  %v335_v16 = vld [vmem:[%s594_s0 + $0xd] sm:$0x1]   ;;  %s410_s9 = smov 106  }
   0x6   :  { %v336_v17 = vld [vmem:[%s594_s0 + $0x1a] sm:$0x1]   ;;  %s411_s10 = smov 104   ;;  %v337_v18 = vld [vmem:[%s594_s0 + $0x21] sm:$0x1]   ;;  %s412_s15 = smov 102  }
   0x7   :  { %v338_v19 = vld [vmem:[%s594_s0 + $0x28] sm:$0x1]   ;;  %s413_s16 = smov 100   ;;  %v339_v20 = vld [vmem:[%s594_s0 + $0x5] sm:$0x1]   ;;  %vm3_vm5 = vcmask 146432  }
   0x8   :  { %24 = vrot.lane.b32.xlu0 %v23_v8, %s406_s28  ;;  %52 = vrot.lane.b32.xlu1 %v51_v11, %s407_s29  ;;  %v340_v21 = vld [vmem:[%s594_s0 + $0xc] sm:$0x1]   ;;  %v2_v22 = vld [vmem:[%s594_s0] sm:$0x1]   ;;  %s414_s23 = smov 90   ;;  %s415_s24 = smov 88  }
   0x9   :  { %4 = vst.msk [vmem:[#allocation0] sm:$0x1] %vm3_vm5, %v2_v22   ;;  %v341_v23 = vld [vmem:[%s594_s0 + $0x19] sm:$0x1]   ;;  %v342_v24 = vld [vmem:[%s594_s0 + $0x20] sm:$0x1]  }
   0xa   :  { %s416_s29 = smov 86   ;;  %s417_s30 = smov 84   ;;  %v343_v25 = vld [vmem:[%s594_s0 + $0x27] sm:$0x1]   ;;  %v344_v26 = vld [vmem:[%s594_s0 + $0x4] sm:$0x1]  }
   0xb   :  { %s418_s6 = smov 82   ;;  %s419_s7 = smov 72   ;;  %v345_v27 = vld [vmem:[%s594_s0 + $0xb] sm:$0x1]   ;;  %v346_v28 = vld [vmem:[%s594_s0 + $0x18] sm:$0x1]  }
   0xc   :  { %66 = vrot.lane.b32.xlu0 %v65_v14, %s408_s3  ;;  %76 = vrot.lane.b32.xlu1 %v334_v15, %s409_s4  ;;  %s420_s12 = smov 70   ;;  %s421_s13 = smov 68   ;;  %v347_v29 = vld [vmem:[%s594_s0 + $0x1f] sm:$0x1]   ;;  %v348_v30 = vld [vmem:[%s594_s0 + $0x26] sm:$0x1]  }
   0xd   :  { %s422_s18 = smov 66   ;;  %s423_s19 = smov 64   ;;  %v349_v31 = vld [vmem:[%s594_s0 + $0x3] sm:$0x1]   ;;  %v350_v32 = vld [vmem:[%s594_s0 + $0xa] sm:$0x1]  }
   0xe   :  { %s425_s25 = smov 52   ;;  %v351_v33 = vld [vmem:[%s594_s0 + $0x11] sm:$0x1]   ;;  %v352_v34 = vld [vmem:[%s594_s0 + $0x1e] sm:$0x1]   ;;  %s427_s2 = smov 48  }
   0xf   :  { %v353_v35 = vld [vmem:[%s594_s0 + $0x25] sm:$0x1]   ;;  %v354_v36 = vld [vmem:[%s594_s0 + $0x2] sm:$0x1]   ;;  %s429_s8 = smov 36   ;;  %s431_s14 = smov 32  }
  0x10   :  { %82 = vrot.lane.b32.xlu0 %v335_v16, %s410_s9  ;;  %89 = vrot.lane.b32.xlu1 %v336_v17, %s411_s10  ;;  %v355_v37 = vld [vmem:[%s594_s0 + $0x9] sm:$0x1]   ;;  %v356_v38 = vld [vmem:[%s594_s0 + $0x10] sm:$0x1]   ;;  %s433_s20 = smov 28   ;;  %s435_s26 = smov 16  }
  0x11   :  { %v357_v39 = vld [vmem:[%s594_s0 + $0x1d] sm:$0x1]   ;;  %v358_v40 = vld [vmem:[%s594_s0 + $0x24] sm:$0x1]   ;;  %v359_v41 = vld [vmem:[%s594_s0 + $0x1] sm:$0x1]  }
  0x12   :  { %v360_v42 = vld [vmem:[%s594_s0 + $0x8] sm:$0x1]   ;;  %v361_v43 = vld [vmem:[%s594_s0 + $0xf] sm:$0x1]   ;;  %v362_v44 = vld [vmem:[%s594_s0 + $0x1c] sm:$0x1]  }
  0x13   :  { %s437_s3 = smov 12   ;;  %v363_v45 = vld [vmem:[%s594_s0 + $0x23] sm:$0x1]   ;;  %s438_s0 = smov 10   ;;  %vm13_vm6 = vcmask 130048   ;;  %vm16_vm7 = vcmask 1048560  }
  0x14   :  { %96 = vrot.lane.b32.xlu0 %v337_v18, %s412_s15  ;;  %103 = vrot.lane.b32.xlu1 %v338_v19, %s413_s16  ;;  %vm40_vm8 = vcmask 97280   ;;  %vm26_vm9 = vcmask 113664   ;;  %vm29_vm10 = vcmask 1048544   ;;  %vm43_vm11 = vcmask 1048528  }
  0x15   :  { %vm57_vm12 = vcmask 1048512   ;;  %vm71_vm13 = vcmask 1048496   ;;  %vm78_vm14 = vcmask 1032032   ;;  %vm84_vm15 = vcmask 1015632  }
  0x16   :  { %vm91_vm0 = vcmask 999232   ;;  %vm98_vm1 = vcmask 982832   ;;  %vm105_vm2 = vcmask 966432   ;;  %vm125_vm5 = vcmask 851632  }
  0x18   :  { %110 = vrot.lane.b32.xlu0 %v339_v20, %s414_s23  ;;  %116 = vrot.lane.b32.xlu1 %v340_v21, %s415_s24  ;;  %s424_s24 = smov 54  }
  0x1c   :  { %123 = vrot.lane.b32.xlu0 %v341_v23, %s416_s29  ;;  %130 = vrot.lane.b32.xlu1 %v342_v24, %s417_s30  ;;  %s426_s30 = smov 50  }
  0x20   :  { %137 = vrot.lane.b32.xlu0 %v343_v25, %s418_s6  ;;  %144 = vrot.lane.b32.xlu1 %v344_v26, %s419_s7  ;;  %s428_s7 = smov 46  }
  0x24   :  { %150 = vrot.lane.b32.xlu0 %v345_v27, %s420_s12  ;;  %157 = vrot.lane.b32.xlu1 %v346_v28, %s421_s13  ;;  %s430_s13 = smov 34  }
  0x28   :  { %164 = vrot.lane.b32.xlu0 %v347_v29, %s422_s18  ;;  %171 = vrot.lane.b32.xlu1 %v348_v30, %s423_s19  ;;  %s432_s19 = smov 30  }
  0x2c   :  { %178 = vrot.lane.b32.xlu0 %v349_v31, %s424_s24  ;;  %184 = vrot.lane.b32.xlu1 %v350_v32, %s425_s25  ;;  %s434_s25 = smov 18  }
  0x30   :  { %191 = vrot.lane.b32.xlu0 %v351_v33, %s426_s30  ;;  %198 = vrot.lane.b32.xlu1 %v352_v34, %s427_s2  ;;  %s436_s2 = smov 14  }
  0x34   :  { %205 = vrot.lane.b32.xlu0 %v353_v35, %s428_s7  ;;  %212 = vrot.lane.b32.xlu1 %v354_v36, %s429_s8 }
  0x38   :  { %218 = vrot.lane.b32.xlu0 %v355_v37, %s430_s13  ;;  %225 = vrot.lane.b32.xlu1 %v356_v38, %s431_s14 }
  0x3c   :  { %232 = vrot.lane.b32.xlu0 %v357_v39, %s432_s19  ;;  %239 = vrot.lane.b32.xlu1 %v358_v40, %s433_s20 }
  0x40   :  { %246 = vrot.lane.b32.xlu0 %v359_v41, %s434_s25  ;;  %252 = vrot.lane.b32.xlu1 %v360_v42, %s435_s26 }
  0x44   :  { %259 = vrot.lane.b32.xlu0 %v361_v43, %s436_s2  ;;  %266 = vrot.lane.b32.xlu1 %v362_v44, %s437_s3 }
  0x48   :  { %273 = vrot.lane.b32.xlu0 %v363_v45, %s438_s0 }
  0x76   :  { %v12_v46 = vpop.permute.xlu0 %11   ;;  %v39_v47 = vpop.permute.xlu1 %38  }
  0x77   :  { %15 = vst.msk [vmem:[#allocation0 + $0x8] sm:$0x1] %vm13_vm6, %v12_v46   ;;  %vm132_vm6 = vcmask 835232  }
  0x78   :  { %17 = vst.msk [vmem:[#allocation0] sm:$0x1] %vm16_vm7, %v12_v46   ;;  %vm139_vm7 = vcmask 818832  }
  0x79   :  { %42 = vst.msk [vmem:[#allocation0 + $0x18] sm:$0x1] %vm40_vm8, %v39_v47   ;;  %vm146_vm8 = vcmask 736832  }
  0x7a   :  { %v25_v48 = vpop.permute.xlu0 %24   ;;  %v53_v49 = vpop.permute.xlu1 %52  }
  0x7b   :  { %28 = vst.msk [vmem:[#allocation0 + $0x10] sm:$0x1] %vm26_vm9, %v25_v48   ;;  %vm152_vm9 = vcmask 720432  }
  0x7c   :  { %31 = vst.msk [vmem:[#allocation0 + $0x8] sm:$0x1] %vm29_vm10, %v25_v48   ;;  %vm159_vm10 = vcmask 704032  }
  0x7d   :  { %45 = vst.msk [vmem:[#allocation0 + $0x10] sm:$0x1] %vm43_vm11, %v39_v47   ;;  %vm166_vm11 = vcmask 687632  }
  0x7e   :  { %56 = vst.msk [vmem:[#allocation0 + $0x20] sm:$0x1] %vm54_vm4, %v53_v49   ;;  %v67_v50 = vpop.permute.xlu0 %66   ;;  %v77_v51 = vpop.permute.xlu1 %76   ;;  %vm118_vm4 = vcmask 868032  }
  0x7f   :  { %59 = vst.msk [vmem:[#allocation0 + $0x18] sm:$0x1] %vm57_vm12, %v53_v49   ;;  %vm173_vm12 = vcmask 671232  }
  0x80   :  { %70 = vst.msk [vmem:[#allocation0 + $0x28] sm:$0x1] %vm50_vm3, %v67_v50   ;;  %vm112_vm3 = vcmask 884432  }
  0x81   :  { %73 = vst.msk [vmem:[#allocation0 + $0x20] sm:$0x1] %vm71_vm13, %v67_v50   ;;  %vm180_vm13 = vcmask 589232  }
  0x82   :  { %79 = vst.msk [vmem:[#allocation0] sm:$0x1] %vm78_vm14, %v77_v51   ;;  %v83_v52 = vpop.permute.xlu0 %82   ;;  %v90_v53 = vpop.permute.xlu1 %89   ;;  %vm186_vm14 = vcmask 572832  }
  0x83   :  { %86 = vst.msk [vmem:[#allocation0 + $0x8] sm:$0x1] %vm84_vm15, %v83_v52   ;;  %vm193_vm15 = vcmask 556432  }
  0x84   :  { %93 = vst.msk [vmem:[#allocation0 + $0x10] sm:$0x1] %vm91_vm0, %v90_v53   ;;  %vm200_vm0 = vcmask 540032  }
  0x86   :  { %v97_v55 = vpop.permute.xlu0 %96   ;;  %v104_v56 = vpop.permute.xlu1 %103  }
  0x87   :  { %v314_v54 = vld [vmem:[#allocation0 + $0x28] sm:$0x1]  ;;  %100 = vst.msk [vmem:[#allocation0 + $0x18] sm:$0x1] %vm98_vm1, %v97_v55   ;;  %vm207_vm1 = vcmask 523632  }
  0x88   :  { %368 = vst [vmem:[%s595_s1 + $0x5] sm:$0x1] %v314_v54  ;;  %107 = vst.msk [vmem:[#allocation0 + $0x20] sm:$0x1] %vm105_vm2, %v104_v56   ;;  %vm214_vm2 = vcmask 441632  }
  0x8a   :  { %v111_v57 = vpop.permute.xlu0 %110   ;;  %v117_v58 = vpop.permute.xlu1 %116  }
  0x8b   :  { %113 = vst.msk [vmem:[#allocation0] sm:$0x1] %vm112_vm3, %v111_v57   ;;  %vm220_vm3 = vcmask 425232  }
  0x8c   :  { %120 = vst.msk [vmem:[#allocation0 + $0x8] sm:$0x1] %vm118_vm4, %v117_v58   ;;  %vm227_vm4 = vcmask 408832  }
  0x8e   :  { %v124_v59 = vpop.permute.xlu0 %123   ;;  %v131_v60 = vpop.permute.xlu1 %130  }
  0x8f   :  { %127 = vst.msk [vmem:[#allocation0 + $0x10] sm:$0x1] %vm125_vm5, %v124_v59   ;;  %vm234_vm5 = vcmask 392432  }
  0x90   :  { %134 = vst.msk [vmem:[#allocation0 + $0x18] sm:$0x1] %vm132_vm6, %v131_v60   ;;  %vm241_vm6 = vcmask 376032  }
  0x92   :  { %v138_v61 = vpop.permute.xlu0 %137   ;;  %v145_v62 = vpop.permute.xlu1 %144  }
  0x93   :  { %141 = vst.msk [vmem:[#allocation0 + $0x20] sm:$0x1] %vm139_vm7, %v138_v61   ;;  %vm248_vm7 = vcmask 294032  }
  0x94   :  { %147 = vst.msk [vmem:[#allocation0] sm:$0x1] %vm146_vm8, %v145_v62   ;;  %vm254_vm8 = vcmask 277632  }
  0x96   :  { %v151_v63 = vpop.permute.xlu0 %150   ;;  %v158_v0 = vpop.permute.xlu1 %157  }
  0x97   :  { %154 = vst.msk [vmem:[#allocation0 + $0x8] sm:$0x1] %vm152_vm9, %v151_v63   ;;  %vm261_vm9 = vcmask 261232  }
  0x98   :  { %161 = vst.msk [vmem:[#allocation0 + $0x10] sm:$0x1] %vm159_vm10, %v158_v0   ;;  %vm268_vm10 = vcmask 244832  }
  0x9a   :  { %v165_v1 = vpop.permute.xlu0 %164   ;;  %v172_v2 = vpop.permute.xlu1 %171  }
  0x9b   :  { %168 = vst.msk [vmem:[#allocation0 + $0x18] sm:$0x1] %vm166_vm11, %v165_v1   ;;  %vm275_vm11 = vcmask 228432  }
  0x9c   :  { %175 = vst.msk [vmem:[#allocation0 + $0x20] sm:$0x1] %vm173_vm12, %v172_v2  }
  0x9e   :  { %v179_v3 = vpop.permute.xlu0 %178   ;;  %v185_v4 = vpop.permute.xlu1 %184  }
  0x9f   :  { %181 = vst.msk [vmem:[#allocation0] sm:$0x1] %vm180_vm13, %v179_v3  }
  0xa0   :  { %188 = vst.msk [vmem:[#allocation0 + $0x8] sm:$0x1] %vm186_vm14, %v185_v4  }
  0xa2   :  { %v192_v5 = vpop.permute.xlu0 %191   ;;  %v199_v6 = vpop.permute.xlu1 %198  }
  0xa3   :  { %195 = vst.msk [vmem:[#allocation0 + $0x10] sm:$0x1] %vm193_vm15, %v192_v5  }
  0xa4   :  { %202 = vst.msk [vmem:[#allocation0 + $0x18] sm:$0x1] %vm200_vm0, %v199_v6  }
  0xa6   :  { %v206_v7 = vpop.permute.xlu0 %205   ;;  %v213_v8 = vpop.permute.xlu1 %212  }
  0xa7   :  { %209 = vst.msk [vmem:[#allocation0 + $0x20] sm:$0x1] %vm207_vm1, %v206_v7  }
  0xa8   :  { %215 = vst.msk [vmem:[#allocation0] sm:$0x1] %vm214_vm2, %v213_v8  }
  0xaa   :  { %v219_v9 = vpop.permute.xlu0 %218   ;;  %v226_v10 = vpop.permute.xlu1 %225  }
  0xab   :  { %222 = vst.msk [vmem:[#allocation0 + $0x8] sm:$0x1] %vm220_vm3, %v219_v9  }
  0xac   :  { %229 = vst.msk [vmem:[#allocation0 + $0x10] sm:$0x1] %vm227_vm4, %v226_v10  }
  0xae   :  { %v233_v11 = vpop.permute.xlu0 %232   ;;  %v240_v12 = vpop.permute.xlu1 %239  }
  0xaf   :  { %236 = vst.msk [vmem:[#allocation0 + $0x18] sm:$0x1] %vm234_vm5, %v233_v11  }
  0xb0   :  { %243 = vst.msk [vmem:[#allocation0 + $0x20] sm:$0x1] %vm241_vm6, %v240_v12  }
  0xb2   :  { %v247_v13 = vpop.permute.xlu0 %246   ;;  %v253_v14 = vpop.permute.xlu1 %252  }
  0xb3   :  { %249 = vst.msk [vmem:[#allocation0] sm:$0x1] %vm248_vm7, %v247_v13  }
  0xb4   :  { %256 = vst.msk [vmem:[#allocation0 + $0x8] sm:$0x1] %vm254_vm8, %v253_v14  }
  0xb6   :  { %v260_v15 = vpop.permute.xlu0 %259   ;;  %v267_v16 = vpop.permute.xlu1 %266  }
  0xb7   :  { %263 = vst.msk [vmem:[#allocation0 + $0x10] sm:$0x1] %vm261_vm9, %v260_v15  }
  0xb8   :  { %270 = vst.msk [vmem:[#allocation0 + $0x18] sm:$0x1] %vm268_vm10, %v267_v16  }
  0xba   :  { %v282_v17 = vld [vmem:[#allocation0] sm:$0x1]  ;;  %v274_v18 = vpop.permute.xlu0 %273  }
  0xbb   :  { %285 = vst [vmem:[%s595_s1] sm:$0x1] %v282_v17  ;;  %v287_v19 = vld [vmem:[#allocation0 + $0x8] sm:$0x1]  ;;  %277 = vst.msk [vmem:[#allocation0 + $0x20] sm:$0x1] %vm275_vm11, %v274_v18  }
  0xbc   :  { %364 = vst [vmem:[%s595_s1 + $0x1] sm:$0x1] %v287_v19 }
  0xbe   :  { %v293_v20 = vld [vmem:[#allocation0 + $0x10] sm:$0x1] }
  0xbf   :  { %365 = vst [vmem:[%s595_s1 + $0x2] sm:$0x1] %v293_v20  ;;  %v300_v21 = vld [vmem:[#allocation0 + $0x18] sm:$0x1] }
  0xc0   :  { %366 = vst [vmem:[%s595_s1 + $0x3] sm:$0x1] %v300_v21 }
  0xc2   :  { %v307_v22 = vld [vmem:[#allocation0 + $0x20] sm:$0x1] }
  0xc3   :  { %367 = vst [vmem:[%s595_s1 + $0x4] sm:$0x1] %v307_v22 }

// kernel: basic_block_forward.1
= control target key start
LH: loop header
LB: loop body
LE: loop exit
PB: predicated region body
PF: predicated region fallthrough
CT: control target
= control target key end

     0   :  { %vm86_vm0 = vcmask 1043456   ;;  %v1551_v3 = vmov 0.0   ;;  %vm82_vm1 = vcmask 293888   ;;  %vm1552_vm2 = vmmov 0   ;;  %s1556_s14 = smov 63   ;;  %s1557_s15 = smov 46   ;;  %s2176_s0 = inlined_call_operand.vmem [shape: f32[36,896], index: 0, kind: input, shape index: {}]   ;;  %s2177_s4 = inlined_call_operand.vmem [shape: f32[8,36], index: 4, kind: input, shape index: {}]   ;;  %s2178_s1 = inlined_call_operand.vmem [shape: f32[1,896], index: 1, kind: input, shape index: {}]   ;;  %s2179_s5 = inlined_call_operand.vmem [shape: f32[8,1], index: 5, kind: input, shape index: {}]   ;;  %s2180_s6 = inlined_call_operand.vmem [shape: f32[8,1], index: 6, kind: input, shape index: {}]   ;;  %s2181_s7 = inlined_call_operand.vmem [shape: f32[8,72], index: 7, kind: input, shape index: {}]   ;;  %s2182_s3 = inlined_call_operand.vmem [shape: f32[4,768], index: 3, kind: input, shape index: {}]   ;;  %s2183_s10 = inlined_call_operand.vmem [shape: f32[8,4], index: 10, kind: input, shape index: {}]   ;;  %s2184_s2 = inlined_call_operand.vmem [shape: f32[1,768], index: 2, kind: input, shape index: {}]   ;;  %s2185_s8 = inlined_call_operand.vmem [shape: f32[8,1], index: 8, kind: input, shape index: {}]   ;;  %s2186_s9 = inlined_call_operand.vmem [shape: f32[8,1], index: 9, kind: input, shape index: {}]   ;;  %s2187_s11 = inlined_call_operand.vmem [shape: f32[8,1], index: 11, kind: input, shape index: {}]   ;;  %s2188_s12 = inlined_call_operand.vmem [shape: f32[8,1], index: 12, kind: input, shape index: {}]   ;;  %s2189_s13 = inlined_call_operand.vmem [shape: f32[8,768], index: 13, kind: output, shape index: {}]  }
   0x1   :  { %v76_v0 = vld [vmem:[%s2176_s0 + $0xe8] sm:$0xf]  ;;  %v75_v1 = vld [vmem:[%s2176_s0 + $0xe0] sm:$0xf]  ;;  %v78_v2 = vld [vmem:[%s2176_s0 + $0xf8] sm:$0xf]  ;;  %172 = vmatprep.mubr.f32.mxu0 %v1551_v3  ;;  %243 = vmatprep.mubr.f32.mxu1 %v1551_v3  ;;  %v392_v37 = vlaneseq }
   0x2   :  { %1486 = vmatprep.subr.msk.mxu0 %vm86_vm0, %v76_v0  ;;  %1489 = vmatprep.subr.msk.mxu1 %vm86_vm0, %v78_v2  ;;  %v69_v4 = vld [vmem:[%s2176_s0 + $0xb0] sm:$0xff]  ;;  %v68_v6 = vld [vmem:[%s2176_s0 + $0xa8] sm:$0xff]  ;;  %v71_v7 = vld [vmem:[%s2176_s0 + $0xc0] sm:$0xff]  ;;  %s1558_s16 = smov 64   ;;  %s1559_s17 = smov 65   ;;  %vm791_vm3 = vcmask 367616  }
   0x3   :  { %v77_v5 = vld [vmem:[%s2176_s0 + $0xf0] sm:$0xf]  ;;  %1487 = vmatpush1.msk.msra.mxu0 %vm86_vm0, %v75_v1  ;;  %v62_v8 = vld [vmem:[%s2176_s0 + $0x78] sm:$0xff]  ;;  %v64_v11 = vld [vmem:[%s2176_s0 + $0x88] sm:$0xff]  ;;  %v1763_v38 = vshrl.u32 %v392_v37, 7  ;;  %s1560_s18 = smov 81  }
   0x4   :  { %1490 = vmatpush1.msk.msra.mxu1 %vm86_vm0, %v77_v5  ;;  %v70_v9 = vld [vmem:[%s2176_s0 + $0xb8] sm:$0xff]  ;;  %132 = vmatprep.subr.mxu0 %v69_v4  ;;  %v61_v10 = vld [vmem:[%s2176_s0 + $0x70] sm:$0xff]  ;;  %v55_v12 = vld [vmem:[%s2176_s0 + $0x40] sm:$0xff]  ;;  %s1561_s19 = smov 82   ;;  %s1562_s20 = smov 83   ;;  %vm758_vm4 = vcmask 375808  }
   0x5   :  { %203 = vmatprep.subr.mxu1 %v71_v7  ;;  %133 = vmatpush1.msra.mxu0 %v68_v6  ;;  %v63_v13 = vld [vmem:[%s2176_s0 + $0x80] sm:$0xff]  ;;  %v57_v14 = vld [vmem:[%s2176_s0 + $0x50] sm:$0xff]  ;;  %v54_v15 = vld [vmem:[%s2176_s0 + $0x38] sm:$0xff]  ;;  %v394_v39 = vsub.s32 0, %v1763_v38  ;;  %v402_v41 = vsub.s32 2, %v1763_v38  ;;  %v398_v42 = vsub.s32 1, %v1763_v38 }
   0x6   :  { %204 = vmatpush1.msra.mxu1 %v70_v9  ;;  %134 = vmatprep.subr.mxu0 %v62_v8  ;;  %v56_v16 = vld [vmem:[%s2176_s0 + $0x48] sm:$0xff]  ;;  %v50_v18 = vld [vmem:[%s2176_s0 + $0x18] sm:$0xff]  ;;  %v47_v19 = vld [vmem:[%s2176_s0] sm:$0xff]  ;;  %v406_v46 = vsub.s32 3, %v1763_v38  ;;  %v410_v52 = vsub.s32 4, %v1763_v38  ;;  %v414_v56 = vsub.s32 5, %v1763_v38 }
   0x7   :  { %205 = vmatprep.subr.mxu1 %v64_v11  ;;  %135 = vmatpush1.msra.mxu0 %v61_v10  ;;  %v48_v17 = vld [vmem:[%s2176_s0 + $0x8] sm:$0xff]  ;;  %v49_v20 = vld [vmem:[%s2176_s0 + $0x10] sm:$0xff]  ;;  %v46_v21 = vld [vmem:[%s2177_s4] sm:$0xff]  ;;  %v418_v1 = vsub.s32 6, %v1763_v38  ;;  %vm725_vm5 = vcmask 384000   ;;  %vm692_vm6 = vcmask 515072  }
   0x8   :  { %206 = vmatpush1.msra.mxu1 %v63_v13  ;;  %136 = vmatprep.subr.mxu0 %v55_v12  ;;  %v80_v22 = vld [vmem:[%s2176_s0 + $0x108] sm:$0xf]  ;;  %v79_v23 = vld [vmem:[%s2176_s0 + $0x100] sm:$0xf]  ;;  %v73_v24 = vld [vmem:[%s2176_s0 + $0xd0] sm:$0xff]  ;;  %vm659_vm7 = vcmask 523264  }
   0x9   :  { %207 = vmatprep.subr.mxu1 %v57_v14  ;;  %137 = vmatpush1.msra.mxu0 %v54_v15  ;;  %v72_v25 = vld [vmem:[%s2176_s0 + $0xc8] sm:$0xff]  ;;  %v81_v26 = vld [vmem:[%s2176_s0 + $0x110] sm:$0xf]  ;;  %v66_v27 = vld [vmem:[%s2176_s0 + $0x98] sm:$0xff]  ;;  %vm626_vm8 = vcmask 531456   ;;  %vm593_vm9 = vcmask 662528  }
   0xa   :  { %208 = vmatpush1.msra.mxu1 %v56_v16  ;;  %138 = vmatprep.subr.mxu0 %v48_v17  ;;  %v65_v28 = vld [vmem:[%s2176_s0 + $0x90] sm:$0xff]  ;;  %v74_v29 = vld [vmem:[%s2176_s0 + $0xd8] sm:$0xff]  ;;  %v59_v30 = vld [vmem:[%s2176_s0 + $0x60] sm:$0xff]  ;;  %vm560_vm10 = vcmask 670720   ;;  %vm527_vm11 = vcmask 678912   ;;  %vm865_vm12 = vcmask 588800  }
   0xb   :  { %209 = vmatprep.subr.mxu1 %v50_v18  ;;  %139 = vmatpush1.msra.mxu0 %v47_v19  ;;  %v58_v31 = vld [vmem:[%s2176_s0 + $0x58] sm:$0xff]  ;;  %v67_v32 = vld [vmem:[%s2176_s0 + $0xa0] sm:$0xff]  ;;  %v52_v33 = vld [vmem:[%s2176_s0 + $0x28] sm:$0xff]  ;;  %vm1182_vm13 = vcmask 31744  }
   0xc   :  { %210 = vmatpush1.msra.mxu1 %v49_v20  ;;  %1488 = vmatmul.mubr.msk.f32.vlgmr.msra.gmra.mxu0 %vm82_vm1, %v46_v21  ;;  %v51_v34 = vld [vmem:[%s2176_s0 + $0x20] sm:$0xff]  ;;  %v60_v35 = vld [vmem:[%s2176_s0 + $0x68] sm:$0xff]  ;;  %v53_v36 = vld [vmem:[%s2176_s0 + $0x30] sm:$0xff] }
   0xd   :  { %1492 = vmatprep.subr.msk.mxu0 %vm86_vm0, %v80_v22  ;;  %1491 = vmatmul.mubr.msk.f32.vlgmr.msra.gmra.mxu1 %vm82_vm1, %v46_v21  ;;  %v44_v40 = vld [vmem:[%s2178_s1] sm:$0xff] }
   0xe   :  { %1493 = vmatpush1.msk.msra.mxu0 %vm86_vm0, %v79_v23  ;;  %1515 = vmatprep.subr.mxu1 %v1551_v3  ;;  %v1773_v43 = vrot.slane %v44_v40, %v394_v39  ;;  %v1777_v44 = vrot.slane %v44_v40, %v402_v41  ;;  %v1781_v45 = vrot.slane %v44_v40, %v398_v42 }
   0xf   :  { %274 = vmatprep.subr.mxu0 %v73_v24  ;;  %1516 = vmatpush3.msk.msra.mxu1 %vm86_vm0, %v81_v26  ;;  %v1796_v54 = vrot.slane %v44_v40, %v406_v46  ;;  %v1805_v61 = vrot.slane %v44_v40, %v410_v52  ;;  %v1812_v4 = vrot.slane %v44_v40, %v414_v56 }
  0x10   :  { %275 = vmatpush1.msra.mxu0 %v72_v25  ;;  %1517 = vmatprep.subr.mxu1 %v1551_v3  ;;  %v1819_v9 = vrot.slane %v44_v40, %v418_v1  ;;  %v1553_v25 = vmov 0  }
  0x11   :  { %276 = vmatprep.subr.mxu0 %v66_v27  ;;  %1518 = vmatpush3.msra.mxu1 %v74_v29 }
  0x12   :  { %277 = vmatpush1.msra.mxu0 %v65_v28  ;;  %1519 = vmatprep.subr.mxu1 %v1551_v3 }
  0x13   :  { %278 = vmatprep.subr.mxu0 %v59_v30  ;;  %1520 = vmatpush3.msra.mxu1 %v67_v32 }
  0x14   :  { %279 = vmatpush1.msra.mxu0 %v58_v31  ;;  %1521 = vmatprep.subr.mxu1 %v1551_v3 }
  0x15   :  { %280 = vmatprep.subr.mxu0 %v52_v33  ;;  %314 = vmatprep.mubr.f32.mxu0 %v1551_v3  ;;  %v461_v33 = vld [vmem:[%s2179_s5] sm:$0xff]  ;;  %s1554_s5 = smov 45  }
  0x16   :  { %281 = vmatpush1.msra.mxu0 %v51_v34  ;;  %1522 = vmatpush3.msra.mxu1 %v60_v35 }
  0x17   :  { %1494 = vmatmul.mubr.msk.f32.vlgmr.msra.gmra.mxu0 %vm82_vm1, %v46_v21  ;;  %1523 = vmatprep.subr.mxu1 %v1551_v3 }
  0x18   :  { %1525 = vmatprep.mubr.msk.f32.mxu1 %vm1552_vm2, %v1551_v3  ;;  %1524 = vmatpush3.msra.mxu1 %v53_v36  ;;  %v465_v36 = vld [vmem:[%s2180_s6] sm:$0xff]  ;;  %s1555_s6 = smov 47  }
  0x19   :  { %933 = vmatprep.mubr.f32.mxu0 %v1551_v3  ;;  %1526 = vmatmul.mubr.msk.f32.vlgmr.msra.gmra.mxu1 %vm82_vm1, %v46_v21 }
  0x1a   :  { %1004 = vmatprep.mubr.f32.mxu1 %v1551_v3  ;;  %1540 = vset.pattern.permute.xlu1 %v1553_v25 }
  0x1b   :  { %1541 = vset.pattern.permute.xlu0 %v1553_v25 }
  0xcc   :  { %v1784_v47 = vpop.f32.mrf.mxu0 }
  0xcd   :  { %v427_v48 = vmul.f32 %v1773_v43, %v1784_v47  ;;  %v1788_v49 = vpop.f32.mrf.mxu1 }
  0xce   :  { %v429_v50 = vmul.f32 %v1777_v44, %v1788_v49  ;;  %v176_v51 = vpop.f32.mrf.mxu0 }
  0xcf   :  { %v428_v53 = vmul.f32 %v1781_v45, %v176_v51  ;;  %v1798_v55 = vpop.f32.mrf.mxu1  ;;  %v443_v57 = vmul.f32 %v427_v48, %v1784_v47 }
  0xd0   :  { %v445_v58 = vmul.f32 %v429_v50, %v1788_v49  ;;  %v430_v63 = vmul.f32 %v1796_v54, %v1798_v55 }
  0xd1   :  { %v434_v59 = vadd.f32 %v428_v53, %v427_v48  ;;  %v444_v60 = vmul.f32 %v428_v53, %v176_v51 }
  0xd2   :  { %v446_v7 = vmul.f32 %v430_v63, %v1798_v55 }
  0xd3   :  { %v450_v62 = vadd.f32 %v444_v60, %v443_v57  ;;  %v435_v0 = vadd.f32 %v434_v59, %v429_v50 }
  0xd5   :  { %v451_v2 = vadd.f32 %v450_v62, %v445_v58  ;;  %v436_v6 = vadd.f32 %v435_v0, %v430_v63 }
  0xd7   :  { %v1814_v5 = vpop.f32.mrf.mxu0  ;;  %v452_v11 = vadd.f32 %v451_v2, %v446_v7 }
  0xd8   :  { %v431_v8 = vmul.f32 %v1805_v61, %v1814_v5 }
  0xd9   :  { %v1821_v10 = vpop.f32.mrf.mxu0  ;;  %v1826_v14 = vpop.f32.mrf.mxu1 }
  0xda   :  { %v447_v12 = vmul.f32 %v431_v8, %v1814_v5  ;;  %v432_v13 = vmul.f32 %v1812_v4, %v1821_v10  ;;  %v437_v15 = vadd.f32 %v436_v6, %v431_v8  ;;  %v433_v18 = vmul.f32 %v1819_v9, %v1826_v14 }
  0xdb   :  { %v1527_v17 = vpop.f32.mrf.mxu1 }
  0xdc   :  { %v448_v16 = vmul.f32 %v432_v13, %v1821_v10  ;;  %v438_v19 = vadd.f32 %v437_v15, %v432_v13  ;;  %v453_v20 = vadd.f32 %v452_v11, %v447_v12  ;;  %v449_v23 = vmul.f32 %v433_v18, %v1826_v14 }
  0xde   :  { %v439_v21 = vadd.f32 %v438_v19, %v433_v18  ;;  %v454_v22 = vadd.f32 %v453_v20, %v448_v16 }
  0xe0   :  { %440 = vadd.xlane.f32.xlu0 %v439_v21  ;;  %v455_v24 = vadd.f32 %v454_v22, %v449_v23 }
  0xe4   :  { %456 = vadd.xlane.f32.xlu0 %v455_v24 }
 0x169   :  { %v441_v26 = vpop.xlane.xlu0 %440 }
 0x16a   :  { %v442_v27 = vmul.f32 0.001953125, %v441_v26 }
 0x16c   :  { %v459_v29 = vmul.f32 %v442_v27, %v442_v27 }
 0x16d   :  { %v457_v28 = vpop.xlane.xlu0 %456 }
 0x16e   :  { %v458_v30 = vmul.f32 0.001953125, %v457_v28 }
 0x170   :  { %v460_v31 = vsub.f32 %v458_v30, %v459_v29 }
 0x172   :  { %v462_v32 = vadd.f32 1e-05, %v460_v31 }
 0x174   :  { %1545 = vrsqrt.f32 %v462_v32 }
 0x181   :  { %v1546_v34 = vpop.eup %1545 }
 0x182   :  { %v464_v35 = vmul.f32 %v1546_v34, %v461_v33 }
 0x184   :  { %470 = vperm.xlu1 %1540, %v464_v35   ;;  %v466_v37 = vmul.f32 %v464_v35, %v442_v27 }
 0x186   :  { %v467_v40 = vsub.f32 %v465_v36, %v466_v37 }
 0x188   :  { %482 = vperm.xlu1 %1540, %v467_v40  }
 0x1ff   :  { %v1838_v48 = vpop.permute.xlu1 %470 }
 0x200   :  { %v473_v50 = vmul.f32 %v1838_v48, %v1784_v47  ;;  %v474_v53 = vmul.f32 %v1838_v48, %v176_v51  ;;  %v475_v57 = vmul.f32 %v1838_v48, %v1788_v49  ;;  %v477_v51 = vmul.f32 %v1838_v48, %v1814_v5 }
 0x203   :  { %v1845_v58 = vpop.permute.xlu1 %482 }
 0x204   :  { %v485_v59 = vadd.f32 %v1845_v58, %v473_v50  ;;  %v486_v60 = vadd.f32 %v1845_v58, %v474_v53  ;;  %v487_v62 = vadd.f32 %v1845_v58, %v475_v57 }
 0x206   :  { %v493_v63 = vmax.f32 %v486_v60, 0.0  ;;  %v494_v0 = vmax.f32 %v487_v62, 0.0  ;;  %v492_v1 = vmax.f32 %v485_v59, 0.0 }
 0x208   :  { %v500_v2 = vmul.f32 %v493_v63, %v1781_v45  ;;  %v501_v47 = vmul.f32 %v494_v0, %v1777_v44  ;;  %v499_v49 = vmul.f32 %v492_v1, %v1773_v43  ;;  %v489_v44 = vadd.f32 %v1845_v58, %v477_v51 }
 0x209   :  { %v476_v45 = vmul.f32 %v1838_v48, %v1798_v55 }
 0x20a   :  { %781 = vrot.lane.b32.xlu1 %v501_v47, %s1554_s5  ;;  %779 = vrot.lane.b32.xlu0 %v500_v2, %s1554_s5  ;;  %v496_v43 = vmax.f32 %v489_v44, 0.0 }
 0x20b   :  { %v488_v5 = vadd.f32 %v1845_v58, %v476_v45 }
 0x20c   :  { %v503_v6 = vmul.f32 %v496_v43, %v1805_v61 }
 0x20d   :  { %v495_v7 = vmax.f32 %v488_v5, 0.0 }
 0x20e   :  { %715 = vrot.lane.b32.xlu0 %v501_v47, %s1555_s6  ;;  %777 = vrot.lane.b32.xlu1 %v499_v49, %s1554_s5 }
 0x20f   :  { %v502_v55 = vmul.f32 %v495_v7, %v1796_v54  ;;  %v478_v54 = vmul.f32 %v1838_v48, %v1821_v10  ;;  %v479_v10 = vmul.f32 %v1838_v48, %v1826_v14 }
 0x211   :  { %v490_v61 = vadd.f32 %v1845_v58, %v478_v54  ;;  %v491_v12 = vadd.f32 %v1845_v58, %v479_v10 }
 0x212   :  { %680 = vrot.lane.b32.xlu0 %v500_v2, %s1556_s14  ;;  %746 = vrot.lane.b32.xlu1 %v500_v2, %s1557_s15 }
 0x213   :  { %v497_v8 = vmax.f32 %v490_v61, 0.0 }
 0x215   :  { %v504_v11 = vmul.f32 %v497_v8, %v1812_v4  ;;  %v498_v4 = vmax.f32 %v491_v12, 0.0 }
 0x216   :  { %678 = vrot.lane.b32.xlu0 %v499_v49, %s1556_s14  ;;  %748 = vrot.lane.b32.xlu1 %v501_v47, %s1557_s15 }
 0x217   :  { %v505_v13 = vmul.f32 %v498_v4, %v1819_v9 }
 0x21a   :  { %649 = vrot.lane.b32.xlu0 %v501_v47, %s1558_s16  ;;  %744 = vrot.lane.b32.xlu1 %v499_v49, %s1557_s15 }
 0x21e   :  { %785 = vrot.lane.b32.xlu0 %v503_v6, %s1554_s5  ;;  %713 = vrot.lane.b32.xlu1 %v500_v2, %s1555_s6 }
 0x222   :  { %614 = vrot.lane.b32.xlu0 %v500_v2, %s1559_s17  ;;  %711 = vrot.lane.b32.xlu1 %v499_v49, %s1555_s6 }
 0x226   :  { %750 = vrot.lane.b32.xlu0 %v502_v55, %s1557_s15  ;;  %682 = vrot.lane.b32.xlu1 %v501_v47, %s1556_s14 }
 0x22a   :  { %612 = vrot.lane.b32.xlu0 %v499_v49, %s1559_s17  ;;  %647 = vrot.lane.b32.xlu1 %v500_v2, %s1558_s16 }
 0x22e   :  { %583 = vrot.lane.b32.xlu0 %v501_v47, %s1560_s18  ;;  %783 = vrot.lane.b32.xlu1 %v502_v55, %s1554_s5 }
 0x232   :  { %719 = vrot.lane.b32.xlu0 %v503_v6, %s1555_s6  ;;  %645 = vrot.lane.b32.xlu1 %v499_v49, %s1558_s16 }
 0x236   :  { %548 = vrot.lane.b32.xlu0 %v500_v2, %s1561_s19  ;;  %616 = vrot.lane.b32.xlu1 %v501_v47, %s1559_s17 }
 0x23a   :  { %684 = vrot.lane.b32.xlu0 %v502_v55, %s1556_s14  ;;  %752 = vrot.lane.b32.xlu1 %v503_v6, %s1557_s15 }
 0x23e   :  { %546 = vrot.lane.b32.xlu0 %v499_v49, %s1561_s19  ;;  %581 = vrot.lane.b32.xlu1 %v500_v2, %s1560_s18 }
 0x242   :  { %517 = vrot.lane.b32.xlu0 %v501_v47, %s1562_s20  ;;  %717 = vrot.lane.b32.xlu1 %v502_v55, %s1555_s6 }
 0x246   :  { %653 = vrot.lane.b32.xlu0 %v503_v6, %s1558_s16  ;;  %579 = vrot.lane.b32.xlu1 %v499_v49, %s1560_s18 }
 0x24a   :  { %618 = vrot.lane.b32.xlu0 %v502_v55, %s1559_s17  ;;  %550 = vrot.lane.b32.xlu1 %v501_v47, %s1561_s19 }
 0x24e   :  { %787 = vrot.lane.b32.xlu0 %v504_v11, %s1554_s5  ;;  %686 = vrot.lane.b32.xlu1 %v503_v6, %s1556_s14 }
 0x252   :  { %585 = vrot.lane.b32.xlu0 %v502_v55, %s1560_s18  ;;  %515 = vrot.lane.b32.xlu1 %v500_v2, %s1562_s20 }
 0x256   :  { %754 = vrot.lane.b32.xlu0 %v504_v11, %s1557_s15  ;;  %651 = vrot.lane.b32.xlu1 %v502_v55, %s1558_s16 }
 0x25a   :  { %552 = vrot.lane.b32.xlu0 %v502_v55, %s1561_s19  ;;  %513 = vrot.lane.b32.xlu1 %v499_v49, %s1562_s20 }
 0x25e   :  { %721 = vrot.lane.b32.xlu0 %v504_v11, %s1555_s6  ;;  %620 = vrot.lane.b32.xlu1 %v503_v6, %s1559_s17 }
 0x262   :  { %519 = vrot.lane.b32.xlu0 %v502_v55, %s1562_s20  ;;  %789 = vrot.lane.b32.xlu1 %v505_v13, %s1554_s5 }
 0x266   :  { %688 = vrot.lane.b32.xlu0 %v504_v11, %s1556_s14  ;;  %587 = vrot.lane.b32.xlu1 %v503_v6, %s1560_s18 }
 0x26a   :  { %655 = vrot.lane.b32.xlu0 %v504_v11, %s1558_s16  ;;  %756 = vrot.lane.b32.xlu1 %v505_v13, %s1557_s15 }
 0x26e   :  { %622 = vrot.lane.b32.xlu0 %v504_v11, %s1559_s17  ;;  %554 = vrot.lane.b32.xlu1 %v503_v6, %s1561_s19 }
 0x272   :  { %589 = vrot.lane.b32.xlu0 %v504_v11, %s1560_s18  ;;  %723 = vrot.lane.b32.xlu1 %v505_v13, %s1555_s6 }
 0x276   :  { %556 = vrot.lane.b32.xlu0 %v504_v11, %s1561_s19  ;;  %521 = vrot.lane.b32.xlu1 %v503_v6, %s1562_s20 }
 0x27a   :  { %523 = vrot.lane.b32.xlu0 %v504_v11, %s1562_s20  ;;  %690 = vrot.lane.b32.xlu1 %v505_v13, %s1556_s14 }
 0x27c   :  { %v782_v9 = vpop.permute.xlu1 %781  ;;  %v780_v14 = vpop.permute.xlu0 %779 }
 0x27d   :  { %v793_v15 = vsel %vm791_vm3, %v780_v14, %v782_v9 }
 0x27e   :  { %883 = vmatprep.subr.mxu0 %v793_v15  ;;  %657 = vrot.lane.b32.xlu1 %v505_v13, %s1558_s16 }
 0x280   :  { %v1929_v16 = vpop.permute.xlu0 %715  ;;  %v778_v17 = vpop.permute.xlu1 %777 }
 0x281   :  { %v792_v18 = vsel %vm791_vm3, %v778_v17, %v780_v14 }
 0x282   :  { %624 = vrot.lane.b32.xlu1 %v505_v13, %s1559_s17  ;;  %884 = vmatpush1.msra.mxu0 %v792_v18 }
 0x284   :  { %v681_v19 = vpop.permute.xlu0 %680  ;;  %v747_v20 = vpop.permute.xlu1 %746 }
 0x286   :  { %591 = vrot.lane.b32.xlu1 %v505_v13, %s1560_s18 }
 0x288   :  { %v679_v21 = vpop.permute.xlu0 %678  ;;  %v749_v22 = vpop.permute.xlu1 %748 }
 0x289   :  { %v760_v23 = vsel %vm758_vm4, %v747_v20, %v749_v22  ;;  %v693_v36 = vsel %vm692_vm6, %v679_v21, %v681_v19 }
 0x28a   :  { %558 = vrot.lane.b32.xlu1 %v505_v13, %s1561_s19  ;;  %885 = vmatprep.subr.mxu0 %v760_v23 }
 0x28c   :  { %v1936_v24 = vpop.permute.xlu0 %649  ;;  %v745_v25 = vpop.permute.xlu1 %744 }
 0x28d   :  { %v759_v26 = vsel %vm758_vm4, %v745_v25, %v747_v20 }
 0x28e   :  { %525 = vrot.lane.b32.xlu1 %v505_v13, %s1562_s20  ;;  %886 = vmatpush1.msra.mxu0 %v759_v26  ;;  %v1991_v26 = vld [vmem:[%s2181_s7] sm:$0xff] }
 0x290   :  { %v1940_v27 = vpop.permute.xlu0 %785  ;;  %v714_v28 = vpop.permute.xlu1 %713 }
 0x291   :  { %v727_v29 = vsel %vm725_vm5, %v714_v28, %v1929_v16 }
 0x292   :  { %887 = vmatprep.subr.mxu0 %v727_v29 }
 0x294   :  { %v615_v30 = vpop.permute.xlu0 %614  ;;  %v712_v31 = vpop.permute.xlu1 %711 }
 0x295   :  { %v726_v32 = vsel %vm725_vm5, %v712_v31, %v714_v28 }
 0x296   :  { %888 = vmatpush1.msra.mxu0 %v726_v32 }
 0x298   :  { %v751_v33 = vpop.permute.xlu0 %750  ;;  %v683_v34 = vpop.permute.xlu1 %682 }
 0x299   :  { %v694_v35 = vsel %vm692_vm6, %v681_v19, %v683_v34  ;;  %v761_v44 = vsel %vm758_vm4, %v749_v22, %v751_v33 }
 0x29a   :  { %889 = vmatprep.subr.mxu0 %v694_v35 }
 0x29b   :  { %890 = vmatpush1.msra.mxu0 %v693_v36 }
 0x29c   :  { %v613_v37 = vpop.permute.xlu0 %612  ;;  %v648_v40 = vpop.permute.xlu1 %647 }
 0x29d   :  { %v661_v48 = vsel %vm659_vm7, %v648_v40, %v1936_v24  ;;  %v627_v2 = vsel %vm626_vm8, %v613_v37, %v615_v30 }
 0x29e   :  { %891 = vmatprep.subr.mxu0 %v661_v48 }
 0x2a0   :  { %v1949_v50 = vpop.permute.xlu0 %583  ;;  %v784_v53 = vpop.permute.xlu1 %783 }
 0x2a1   :  { %v794_v57 = vsel %vm791_vm3, %v782_v9, %v784_v53  ;;  %v795_v58 = vsel %vm791_vm3, %v784_v53, %v1940_v27 }
 0x2a2   :  { %954 = vmatprep.subr.mxu1 %v795_v58 }
 0x2a3   :  { %955 = vmatpush1.msra.mxu1 %v794_v57 }
 0x2a4   :  { %v1954_v59 = vpop.permute.xlu0 %719  ;;  %v646_v60 = vpop.permute.xlu1 %645 }
 0x2a5   :  { %v660_v62 = vsel %vm659_vm7, %v646_v60, %v648_v40 }
 0x2a6   :  { %892 = vmatpush1.msra.mxu0 %v660_v62 }
 0x2a8   :  { %v549_v63 = vpop.permute.xlu0 %548  ;;  %v617_v0 = vpop.permute.xlu1 %616 }
 0x2a9   :  { %v628_v1 = vsel %vm626_vm8, %v615_v30, %v617_v0 }
 0x2aa   :  { %893 = vmatprep.subr.mxu0 %v628_v1  ;;  %v1173_v1 = vld [vmem:[%s2182_s3] sm:$0xff] }
 0x2ab   :  { %894 = vmatpush1.msra.mxu0 %v627_v2 }
 0x2ac   :  { %v685_v47 = vpop.permute.xlu0 %684  ;;  %v1959_v49 = vpop.permute.xlu1 %752 }
 0x2ad   :  { %v762_v51 = vsel %vm758_vm4, %v751_v33, %v1959_v49 }
 0x2ae   :  { %956 = vmatprep.subr.mxu1 %v762_v51 }
 0x2af   :  { %957 = vmatpush1.msra.mxu1 %v761_v44  ;;  %v1179_v44 = vcombine.high %v1173_v1, %v1173_v1 }
 0x2b0   :  { %v547_v43 = vpop.permute.xlu0 %546  ;;  %v582_v45 = vpop.permute.xlu1 %581 }
 0x2b1   :  { %v595_v5 = vsel %vm593_vm9, %v582_v45, %v1949_v50  ;;  %v561_v13 = vsel %vm560_vm10, %v547_v43, %v549_v63 }
 0x2b2   :  { %895 = vmatprep.subr.mxu0 %v595_v5 }
 0x2b4   :  { %v1966_v6 = vpop.permute.xlu0 %517  ;;  %v718_v7 = vpop.permute.xlu1 %717 }
 0x2b5   :  { %v728_v55 = vsel %vm725_vm5, %v1929_v16, %v718_v7  ;;  %v729_v54 = vsel %vm725_vm5, %v718_v7, %v1954_v59  ;;  %v695_v16 = vsel %vm692_vm6, %v683_v34, %v685_v47 }
 0x2b6   :  { %958 = vmatprep.subr.mxu1 %v729_v54 }
 0x2b7   :  { %959 = vmatpush1.msra.mxu1 %v728_v55 }
 0x2b8   :  { %v1972_v61 = vpop.permute.xlu0 %653  ;;  %v580_v8 = vpop.permute.xlu1 %579 }
 0x2b9   :  { %v594_v11 = vsel %vm593_vm9, %v580_v8, %v582_v45 }
 0x2ba   :  { %896 = vmatpush1.msra.mxu0 %v594_v11 }
 0x2bc   :  { %v619_v10 = vpop.permute.xlu0 %618  ;;  %v551_v12 = vpop.permute.xlu1 %550 }
 0x2bd   :  { %v562_v4 = vsel %vm560_vm10, %v549_v63, %v551_v12  ;;  %v629_v31 = vsel %vm626_vm8, %v617_v0, %v619_v10 }
 0x2be   :  { %897 = vmatprep.subr.mxu0 %v562_v4 }
 0x2bf   :  { %898 = vmatpush1.msra.mxu0 %v561_v13 }
 0x2c0   :  { %v788_v9 = vpop.permute.xlu0 %787  ;;  %v1977_v14 = vpop.permute.xlu1 %686 }
 0x2c1   :  { %v696_v15 = vsel %vm692_vm6, %v685_v47, %v1977_v14  ;;  %v796_v35 = vsel %vm791_vm3, %v1940_v27, %v788_v9 }
 0x2c2   :  { %960 = vmatprep.subr.mxu1 %v696_v15 }
 0x2c3   :  { %961 = vmatpush1.msra.mxu1 %v695_v16 }
 0x2c4   :  { %v586_v17 = vpop.permute.xlu0 %585  ;;  %v516_v18 = vpop.permute.xlu1 %515 }
 0x2c5   :  { %v529_v19 = vsel %vm527_vm11, %v516_v18, %v1966_v6  ;;  %v596_v40 = vsel %vm593_vm9, %v1949_v50, %v586_v17 }
 0x2c6   :  { %899 = vmatprep.subr.mxu0 %v529_v19 }
 0x2c8   :  { %v652_v20 = vpop.permute.xlu1 %651  ;;  %v755_v21 = vpop.permute.xlu0 %754 }
 0x2c9   :  { %v662_v22 = vsel %vm659_vm7, %v1936_v24, %v652_v20  ;;  %v663_v23 = vsel %vm659_vm7, %v652_v20, %v1972_v61  ;;  %v763_v58 = vsel %vm758_vm4, %v1959_v49, %v755_v21  ;;  %v1174_v49 = vld [vmem:[%s2182_s3 + $0x8] sm:$0xff] }
 0x2ca   :  { %962 = vmatprep.subr.mxu1 %v663_v23  ;;  %v1180_v5 = vcombine.high %v1174_v49, %v1174_v49 }
 0x2cb   :  { %963 = vmatpush1.msra.mxu1 %v662_v22 }
 0x2cc   :  { %v514_v25 = vpop.permute.xlu1 %513  ;;  %v553_v29 = vpop.permute.xlu0 %552 }
 0x2cd   :  { %v528_v28 = vsel %vm527_vm11, %v514_v25, %v516_v18  ;;  %v563_v63 = vsel %vm560_vm10, %v551_v12, %v553_v29 }
 0x2ce   :  { %900 = vmatpush1.msra.mxu0 %v528_v28 }
 0x2cf   :  { %1497 = vmatmul.mubr.msk.f32.vlgmr.msra.gmra.mxu0 %vm865_vm12, %v1991_v26 }
 0x2d0   :  { %v1996_v24 = vpop.permute.xlu1 %620  ;;  %1075 = vmatprep.mubr.f32.mxu0 %v1551_v3  ;;  %v722_v33 = vpop.permute.xlu0 %721 }
 0x2d1   :  { %v630_v30 = vsel %vm626_vm8, %v619_v10, %v1996_v24  ;;  %v730_v2 = vsel %vm725_vm5, %v1954_v59, %v722_v33  ;;  %v1175_v59 = vld [vmem:[%s2182_s3 + $0x10] sm:$0xff] }
 0x2d2   :  { %964 = vmatprep.subr.mxu1 %v630_v30  ;;  %v1181_v11 = vcombine.high %v1175_v59, %v1175_v59 }
 0x2d3   :  { %965 = vmatpush1.msra.mxu1 %v629_v31 }
 0x2d4   :  { %v790_v32 = vpop.permute.xlu1 %789  ;;  %v520_v48 = vpop.permute.xlu0 %519 }
 0x2d5   :  { %v797_v34 = vsel %vm791_vm3, %v788_v9, %v790_v32  ;;  %v530_v45 = vsel %vm527_vm11, %v1966_v6, %v520_v48  ;;  %v1172_v6 = vld [vmem:[%s2183_s10] sm:$0xff] }
 0x2d6   :  { %1025 = vmatprep.subr.mxu0 %v797_v34 }
 0x2d7   :  { %1026 = vmatpush1.msra.mxu0 %v796_v35 }
 0x2d8   :  { %v2005_v36 = vpop.permute.xlu1 %587  ;;  %v689_v60 = vpop.permute.xlu0 %688 }
 0x2d9   :  { %v597_v37 = vsel %vm593_vm9, %v586_v17, %v2005_v36  ;;  %v697_v8 = vsel %vm692_vm6, %v1977_v14, %v689_v60 }
 0x2da   :  { %966 = vmatprep.subr.mxu1 %v597_v37 }
 0x2db   :  { %967 = vmatpush1.msra.mxu1 %v596_v40 }
 0x2dc   :  { %v757_v53 = vpop.permute.xlu1 %756  ;;  %v656_v47 = vpop.permute.xlu0 %655 }
 0x2dd   :  { %v764_v57 = vsel %vm758_vm4, %v755_v21, %v757_v53  ;;  %v664_v4 = vsel %vm659_vm7, %v1972_v61, %v656_v47 }
 0x2de   :  { %1027 = vmatprep.subr.mxu0 %v764_v57 }
 0x2df   :  { %1028 = vmatpush1.msra.mxu0 %v763_v58 }
 0x2e0   :  { %v2014_v27 = vpop.permute.xlu1 %554  ;;  %v623_v55 = vpop.permute.xlu0 %622 }
 0x2e1   :  { %v564_v62 = vsel %vm560_vm10, %v553_v29, %v2014_v27  ;;  %v631_v15 = vsel %vm626_vm8, %v1996_v24, %v623_v55  ;;  %v45_v24 = vld [vmem:[%s2184_s2] sm:$0x3f] }
 0x2e2   :  { %968 = vmatprep.subr.mxu1 %v564_v62 }
 0x2e3   :  { %969 = vmatpush1.msra.mxu1 %v563_v63 }
 0x2e4   :  { %v724_v50 = vpop.permute.xlu1 %723  ;;  %v590_v13 = vpop.permute.xlu0 %589 }
 0x2e5   :  { %v731_v0 = vsel %vm725_vm5, %v722_v33, %v724_v50  ;;  %v598_v18 = vsel %vm593_vm9, %v2005_v36, %v590_v13  ;;  %v1086_v33 = vrot.slane %v45_v24, %v394_v39  ;;  %v1094_v39 = vrot.slane %v45_v24, %v402_v41 }
 0x2e6   :  { %1029 = vmatprep.subr.mxu0 %v731_v0 }
 0x2e7   :  { %1030 = vmatpush1.msra.mxu0 %v730_v2 }
 0x2e8   :  { %v522_v51 = vpop.permute.xlu1 %521  ;;  %v557_v16 = vpop.permute.xlu0 %556 }
 0x2e9   :  { %v531_v43 = vsel %vm527_vm11, %v520_v48, %v522_v51 }
 0x2ea   :  { %970 = vmatprep.subr.mxu1 %v531_v43 }
 0x2eb   :  { %971 = vmatpush1.msra.mxu1 %v530_v45 }
 0x2ec   :  { %v691_v7 = vpop.permute.xlu1 %690  ;;  %1498 = vmatmul.mubr.msk.f32.vlgmr.msra.gmra.mxu1 %vm865_vm12, %v1991_v26  ;;  %1500 = vmatprep.subr.msk.mxu1 %vm86_vm0, %v1179_v44  ;;  %v524_v21 = vpop.permute.xlu0 %523  ;;  %v1102_v44 = vrot.slane %v45_v24, %v410_v52 }
 0x2ed   :  { %v698_v54 = vsel %vm692_vm6, %v689_v60, %v691_v7  ;;  %1501 = vmatpush1.msk.msra.mxu1 %vm86_vm0, %v1173_v1  ;;  %1262 = vmatprep.mubr.f32.mxu1 %v1551_v3  ;;  %v532_v25 = vsel %vm527_vm11, %v522_v51, %v524_v21  ;;  %v1106_v7 = vrot.slane %v45_v24, %v414_v56 }
 0x2ee   :  { %1031 = vmatprep.subr.mxu0 %v698_v54  ;;  %1503 = vmatprep.subr.msk.mxu1 %vm86_vm0, %v1180_v5 }
 0x2ef   :  { %1032 = vmatpush1.msra.mxu0 %v697_v8 }
 0x2f0   :  { %v658_v10 = vpop.permute.xlu1 %657  ;;  %1502 = vmatmul.mubr.msk.f32.vlgmr.msra.gmra.mxu1 %vm1182_vm13, %v1172_v6 }
 0x2f1   :  { %v665_v12 = vsel %vm659_vm7, %v656_v47, %v658_v10  ;;  %1504 = vmatpush1.msk.msra.mxu1 %vm86_vm0, %v1174_v49  ;;  %1333 = vmatprep.mubr.f32.mxu1 %v1551_v3 }
 0x2f2   :  { %1033 = vmatprep.subr.mxu0 %v665_v12  ;;  %1506 = vmatprep.subr.msk.mxu1 %vm86_vm0, %v1181_v11 }
 0x2f3   :  { %1034 = vmatpush1.msra.mxu0 %v664_v4 }
 0x2f4   :  { %v625_v9 = vpop.permute.xlu1 %624  ;;  %1505 = vmatmul.mubr.msk.f32.vlgmr.msra.gmra.mxu1 %vm1182_vm13, %v1172_v6 }
 0x2f5   :  { %v632_v14 = vsel %vm626_vm8, %v623_v55, %v625_v9  ;;  %1507 = vmatpush1.msk.msra.mxu1 %vm86_vm0, %v1175_v59  ;;  %1404 = vmatprep.mubr.f32.mxu1 %v1551_v3  ;;  %v565_v3 = vsel %vm560_vm10, %v2014_v27, %v557_v16  ;;  %v1098_v27 = vrot.slane %v45_v24, %v406_v46 }
 0x2f6   :  { %1035 = vmatprep.subr.mxu0 %v632_v14 }
 0x2f7   :  { %1036 = vmatpush1.msra.mxu0 %v631_v15 }
 0x2f8   :  { %v592_v61 = vpop.permute.xlu1 %591  ;;  %1508 = vmatmul.mubr.msk.f32.vlgmr.msra.gmra.mxu1 %vm1182_vm13, %v1172_v6 }
 0x2f9   :  { %v599_v17 = vsel %vm593_vm9, %v590_v13, %v592_v61 }
 0x2fa   :  { %1037 = vmatprep.subr.mxu0 %v599_v17 }
 0x2fb   :  { %1038 = vmatpush1.msra.mxu0 %v598_v18 }
 0x2fc   :  { %v559_v19 = vpop.permute.xlu1 %558 }
 0x2fd   :  { %v566_v20 = vsel %vm560_vm10, %v557_v16, %v559_v19 }
 0x2fe   :  { %1039 = vmatprep.subr.mxu0 %v566_v20 }
 0x2ff   :  { %1040 = vmatpush1.msra.mxu0 %v565_v3 }
 0x300   :  { %v526_v22 = vpop.permute.xlu1 %525 }
 0x301   :  { %v533_v23 = vsel %vm527_vm11, %v524_v21, %v526_v22 }
 0x302   :  { %1041 = vmatprep.subr.mxu0 %v533_v23 }
 0x303   :  { %1042 = vmatpush1.msra.mxu0 %v532_v25 }
 0x304   :  { %1499 = vmatmul.mubr.msk.f32.vlgmr.msra.gmra.mxu0 %vm865_vm12, %v1991_v26  ;;  %v1090_v26 = vrot.slane %v45_v24, %v398_v42 }
 0x38f   :  { %v2077_v30 = vpop.f32.mrf.mxu0 }
 0x390   :  { %v1113_v48 = vmul.f32 %v1086_v33, %v2077_v30 }
 0x391   :  { %v2089_v35 = vpop.f32.mrf.mxu0 }
 0x392   :  { %v1114_v53 = vmul.f32 %v1090_v26, %v2089_v35  ;;  %v1127_v62 = vmul.f32 %v1113_v48, %v2077_v30 }
 0x394   :  { %v1128_v63 = vmul.f32 %v1114_v53, %v2089_v35  ;;  %v1119_v41 = vadd.f32 %v1114_v53, %v1113_v48 }
 0x396   :  { %v1133_v47 = vadd.f32 %v1128_v63, %v1127_v62  ;;  %v1435_v62 = vld [vmem:[%s2187_s11] sm:$0xff] }
 0x3ac   :  { %v2070_v28 = vpop.f32.mrf.mxu1 }
 0x3ad   :  { %v1115_v50 = vmul.f32 %v1094_v39, %v2070_v28  ;;  %v1143_v39 = vld [vmem:[%s2185_s8] sm:$0xff] }
 0x3ae   :  { %v2072_v29 = vpop.f32.mrf.mxu1 }
 0x3af   :  { %v1129_v46 = vmul.f32 %v1115_v50, %v2070_v28  ;;  %v1116_v49 = vmul.f32 %v1098_v27, %v2072_v29  ;;  %v1120_v51 = vadd.f32 %v1119_v41, %v1115_v50  ;;  %v1147_v27 = vld [vmem:[%s2186_s9] sm:$0xff] }
 0x3b0   :  { %v2079_v31 = vpop.f32.mrf.mxu1 }
 0x3b1   :  { %v1419_v1 = vmul.f32 %v2079_v31, %v2079_v31  ;;  %v1134_v5 = vadd.f32 %v1133_v47, %v1129_v46  ;;  %v1130_v59 = vmul.f32 %v1116_v49, %v2072_v29  ;;  %v1121_v11 = vadd.f32 %v1120_v51, %v1116_v49 }
 0x3b2   :  { %v2081_v32 = vpop.f32.mrf.mxu1 }
 0x3b3   :  { %v1411_v34 = vadd.f32 %v2081_v32, %v2079_v31  ;;  %v1420_v2 = vmul.f32 %v2081_v32, %v2081_v32  ;;  %v1135_v13 = vadd.f32 %v1134_v5, %v1130_v59 }
 0x3b4   :  { %v2091_v36 = vpop.f32.mrf.mxu1 }
 0x3b5   :  { %v1412_v37 = vadd.f32 %v1411_v34, %v2091_v36  ;;  %v1425_v43 = vadd.f32 %v1420_v2, %v1419_v1  ;;  %v1421_v45 = vmul.f32 %v2091_v36, %v2091_v36  ;;  %v1439_v1 = vld [vmem:[%s2188_s12] sm:$0xff] }
 0x3b6   :  { %v2094_v40 = vpop.f32.mrf.mxu1 }
 0x3b7   :  { %v1413_v42 = vadd.f32 %v1412_v37, %v2094_v40  ;;  %v1426_v6 = vadd.f32 %v1425_v43, %v1421_v45  ;;  %v1422_v8 = vmul.f32 %v2094_v40, %v2094_v40 }
 0x3b8   :  { %v2101_v57 = vpop.f32.mrf.mxu1 }
 0x3b9   :  { %v1414_v58 = vadd.f32 %v1413_v42, %v2101_v57  ;;  %v1423_v9 = vmul.f32 %v2101_v57, %v2101_v57  ;;  %v1427_v15 = vadd.f32 %v1426_v6, %v1422_v8 }
 0x3ba   :  { %v2106_v60 = vpop.f32.mrf.mxu1 }
 0x3bb   :  { %v1415_v0 = vadd.f32 %v1414_v58, %v2106_v60  ;;  %v1424_v61 = vmul.f32 %v2106_v60, %v2106_v60  ;;  %v1428_v17 = vadd.f32 %v1427_v15, %v1423_v9 }
 0x3bd   :  { %1416 = vadd.xlane.f32.xlu1 %v1415_v0  ;;  %v1429_v18 = vadd.f32 %v1428_v17, %v1424_v61 }
 0x3c4   :  { %v2125_v55 = vpop.f32.mrf.mxu0 }
 0x3c5   :  { %v1117_v54 = vmul.f32 %v1102_v44, %v2125_v55 }
 0x3c6   :  { %v1079_v52 = vpop.f32.mrf.mxu0 }
 0x3c7   :  { %v1131_v10 = vmul.f32 %v1117_v54, %v2125_v55  ;;  %v1118_v12 = vmul.f32 %v1106_v7, %v1079_v52  ;;  %v1122_v4 = vadd.f32 %v1121_v11, %v1117_v54 }
 0x3c9   :  { %v1132_v38 = vmul.f32 %v1118_v12, %v1079_v52  ;;  %v1123_v56 = vadd.f32 %v1122_v4, %v1118_v12  ;;  %v1136_v14 = vadd.f32 %v1135_v13, %v1131_v10 }
 0x3cb   :  { %1124 = vadd.xlane.f32.xlu0 %v1123_v56  ;;  %v1137_v16 = vadd.f32 %v1136_v14, %v1132_v38 }
 0x3cf   :  { %1138 = vadd.xlane.f32.xlu0 %v1137_v16 }
 0x3d3   :  { %1430 = vadd.xlane.f32.xlu0 %v1429_v18 }
 0x446   :  { %v1417_v3 = vpop.xlane.xlu1 %1416 }
 0x447   :  { %v1418_v25 = vmul.f32 0.001953125, %v1417_v3 }
 0x449   :  { %v1433_v34 = vmul.f32 %v1418_v25, %v1418_v25 }
 0x454   :  { %v1125_v19 = vpop.xlane.xlu0 %1124 }
 0x455   :  { %v1126_v20 = vmul.f32 0.001953125, %v1125_v19 }
 0x457   :  { %v1141_v22 = vmul.f32 %v1126_v20, %v1126_v20 }
 0x458   :  { %v1139_v21 = vpop.xlane.xlu0 %1138 }
 0x459   :  { %v1140_v23 = vmul.f32 0.001953125, %v1139_v21 }
 0x45b   :  { %v1142_v24 = vsub.f32 %v1140_v23, %v1141_v22 }
 0x45c   :  { %v1431_v33 = vpop.xlane.xlu0 %1430 }
 0x45d   :  { %v1144_v26 = vadd.f32 1e-05, %v1142_v24  ;;  %v1432_v37 = vmul.f32 0.001953125, %v1431_v33 }
 0x45f   :  { %1547 = vrsqrt.f32 %v1144_v26  ;;  %v1434_v48 = vsub.f32 %v1432_v37, %v1433_v34 }
 0x461   :  { %v1436_v53 = vadd.f32 1e-05, %v1434_v48 }
 0x463   :  { %1549 = vrsqrt.f32 %v1436_v53 }
 0x46c   :  { %v1548_v42 = vpop.eup %1547 }
 0x46d   :  { %v1146_v58 = vmul.f32 %v1548_v42, %v1143_v39 }
 0x46f   :  { %1152 = vperm.xlu1 %1540, %v1146_v58   ;;  %v1148_v63 = vmul.f32 %v1146_v58, %v1126_v20 }
 0x470   :  { %v1550_v50 = vpop.eup %1549 }
 0x471   :  { %v1149_v0 = vsub.f32 %v1147_v27, %v1148_v63  ;;  %v1438_v41 = vmul.f32 %v1550_v50, %v1435_v62 }
 0x473   :  { %1163 = vperm.xlu1 %1540, %v1149_v0   ;;  %1444 = vperm.xlu0 %1541, %v1438_v41   ;;  %v1440_v2 = vmul.f32 %v1438_v41, %v1418_v25 }
 0x475   :  { %v1441_v47 = vsub.f32 %v1439_v1, %v1440_v2 }
 0x477   :  { %1455 = vperm.xlu1 %1540, %v1441_v47  }
 0x4ea   :  { %v1153_v46 = vpop.permute.xlu1 %1152 }
 0x4eb   :  { %v1155_v44 = vmul.f32 %v1153_v46, %v2077_v30  ;;  %v1156_v43 = vmul.f32 %v1153_v46, %v2089_v35  ;;  %v1157_v45 = vmul.f32 %v1153_v46, %v2070_v28  ;;  %v1158_v5 = vmul.f32 %v1153_v46, %v2072_v29 }
 0x4ec   :  { %v1159_v59 = vmul.f32 %v1153_v46, %v2125_v55  ;;  %v1160_v7 = vmul.f32 %v1153_v46, %v1079_v52 }
 0x4ee   :  { %v1445_v49 = vpop.permute.xlu0 %1444  ;;  %v1164_v51 = vpop.permute.xlu1 %1163 }
 0x4ef   :  { %v1447_v54 = vmul.f32 %v1445_v49, %v2079_v31  ;;  %v1448_v6 = vmul.f32 %v1445_v49, %v2081_v32  ;;  %v1449_v8 = vmul.f32 %v1445_v49, %v2091_v36  ;;  %v1450_v11 = vmul.f32 %v1445_v49, %v2094_v40 }
 0x4f0   :  { %v1451_v10 = vmul.f32 %v1445_v49, %v2101_v57  ;;  %v1452_v30 = vmul.f32 %v1445_v49, %v2106_v60  ;;  %v1166_v35 = vadd.f32 %v1164_v51, %v1155_v44  ;;  %v1167_v12 = vadd.f32 %v1164_v51, %v1156_v43 }
 0x4f1   :  { %v1168_v28 = vadd.f32 %v1164_v51, %v1157_v45  ;;  %v1169_v4 = vadd.f32 %v1164_v51, %v1158_v5  ;;  %v1170_v31 = vadd.f32 %v1164_v51, %v1159_v59  ;;  %v1171_v38 = vadd.f32 %v1164_v51, %v1160_v7 }
 0x4f2   :  { %v1456_v29 = vpop.permute.xlu1 %1455 }
 0x4f3   :  { %v1458_v13 = vadd.f32 %v1456_v29, %v1447_v54  ;;  %v1459_v55 = vadd.f32 %v1456_v29, %v1448_v6  ;;  %v1460_v52 = vadd.f32 %v1456_v29, %v1449_v8  ;;  %v1461_v9 = vadd.f32 %v1456_v29, %v1450_v11 }
 0x4f4   :  { %v1462_v32 = vadd.f32 %v1456_v29, %v1451_v10  ;;  %v1463_v56 = vadd.f32 %v1456_v29, %v1452_v30 }
 0x4f5   :  { %v1464_v36 = vadd.f32 %v1458_v13, %v1166_v35  ;;  %v1465_v14 = vadd.f32 %v1459_v55, %v1167_v12  ;;  %v1466_v40 = vadd.f32 %v1460_v52, %v1168_v28  ;;  %v1467_v15 = vadd.f32 %v1461_v9, %v1169_v4 }
 0x4f6   :  { %v1468_v57 = vadd.f32 %v1462_v32, %v1170_v31  ;;  %v1469_v61 = vadd.f32 %v1463_v56, %v1171_v38 }
 0x4f7   :  { %v1470_v60 = vmax.f32 %v1464_v36, 0.0  ;;  %v1471_v16 = vmax.f32 %v1465_v14, 0.0  ;;  %v1472_v17 = vmax.f32 %v1466_v40, 0.0  ;;  %v1473_v18 = vmax.f32 %v1467_v15, 0.0 }
 0x4f8   :  { %v1474_v19 = vmax.f32 %v1468_v57, 0.0  ;;  %v1475_v20 = vmax.f32 %v1469_v61, 0.0 }
 0x4f9   :  { %1476 = vst [vmem:[%s2189_s13] sm:$0xff] %v1470_v60  ;;  %1477 = vst [vmem:[%s2189_s13 + $0x8] sm:$0xff] %v1471_v16 }
 0x4fa   :  { %1478 = vst [vmem:[%s2189_s13 + $0x10] sm:$0xff] %v1472_v17  ;;  %1479 = vst [vmem:[%s2189_s13 + $0x18] sm:$0xff] %v1473_v18 }
 0x4fb   :  { %1480 = vst [vmem:[%s2189_s13 + $0x20] sm:$0xff] %v1474_v19  ;;  %1481 = vst [vmem:[%s2189_s13 + $0x28] sm:$0xff] %v1475_v20 }

</bundles_post_ra>
